<compile_context>
chip_gen: v7x
topology: tpu7x:2x2x1
jax: 0.10.0
libtpu: 0.0.40
codegen_flags: <defaults>
</compile_context>

<pallas_src>
import functools

import jax
import jax.numpy as jnp
from jax.experimental import pallas as pl
from jax.experimental.pallas import tpu as pltpu


def linear_attention_kernel(x_ref, w_qkv_ref, w_out_ref, b_out_ref, mask_ref,
                            o_ref, *, hidden, batch_tile, seq_len, mxu_dtype):
    """One grid step = one channels-major (C, batch_tile*N) slab.

    x_ref:     (C, bt*N)        channels on sublanes, batch*sequence on lanes
    w_qkv_ref: (3*hidden, C)    to_qkv weight (q scale pre-folded into rows)
    w_out_ref: (C, hidden)      to_out weight
    b_out_ref: (C, 1)           to_out bias (f32)
    mask_ref:  (hidden, hidden) block-diagonal head mask (f32), built in wrapper
    o_ref:     (C, bt*N)
    """
    w_qkv = w_qkv_ref[...]                        # mxu_dtype
    w_out = w_out_ref[...]                        # mxu_dtype
    b_out = b_out_ref[...].astype(jnp.float32)    # (C, 1)
    mask = mask_ref[...]                          # (hidden, hidden) f32

    # ---- to_qkv: one lane-dense matmul for the whole batch tile ----
    x = x_ref[...].astype(mxu_dtype)                                 # (C, bt*N)
    qkv = jnp.dot(w_qkv, x, preferred_element_type=jnp.float32)      # (3*hidden, bt*N)

    ys = []
    for b in range(batch_tile):   # small static unroll; per-b temporaries are tiny
        lo, hi = b * seq_len, (b + 1) * seq_len
        q = qkv[0:hidden, lo:hi]                 # (hidden, N), scale already folded
        k = qkv[hidden:2 * hidden, lo:hi]        # (hidden, N)
        v = qkv[2 * hidden:3 * hidden, lo:hi]    # (hidden, N)

        # ---- softmax over the sequence (lane) axis, deferred normalization ----
        p = jnp.exp(k - jnp.max(k, axis=1, keepdims=True))           # (hidden, N) f32
        recip = pl.reciprocal(jnp.sum(p, axis=1, keepdims=True), approx=False)

        # ---- linear-attention core, all heads in one MXU contraction ----
        # ctx[d, e] = sum_n p[d, n] * v[e, n]; keep same-head blocks;
        # fold the softmax denominator (indexed by d) into the ctx rows.
        ctx = jax.lax.dot_general(
            p.astype(mxu_dtype), v.astype(mxu_dtype),
            (((1,), (1,)), ((), ())),
            preferred_element_type=jnp.float32)                      # (hidden, hidden)
        ctx = ctx * mask * recip

        # ---- re-associated output projection ----
        # m[c, d] = sum_e w_out[c, e] * ctx[d, e]   (C x hidden, N-independent)
        m = jax.lax.dot_general(
            w_out, ctx.astype(mxu_dtype),
            (((1,), (1,)), ((), ())),
            preferred_element_type=jnp.float32)                      # (C, hidden)

        # y[c, n] = sum_d m[c, d] * q[d, n] + b[c]
        y = jnp.dot(m.astype(mxu_dtype), q.astype(mxu_dtype),
                    preferred_element_type=jnp.float32) + b_out      # (C, N)
        ys.append(y)

    # One lane-dense store of the whole block.
    o_ref[...] = jnp.concatenate(ys, axis=1).astype(o_ref.dtype)


def _tpu_budget():
    """(vmem_limit_bytes, multi_tensorcore) for the local TPU generation."""
    vmem_cap = 128 * 1024 * 1024
    try:
        info = pltpu.get_tpu_info()
        vmem_cap = int(getattr(info, "vmem_capacity_bytes", vmem_cap))
    except Exception:
        pass
    multi_tc = vmem_cap <= 64 * 1024 * 1024            # v7x: 64 MiB VMEM, 2 TCs/chip
    vmem_limit = min(max(vmem_cap * 3 // 4, 32 * 1024 * 1024), 96 * 1024 * 1024)
    return int(vmem_limit), bool(multi_tc)


def _pick_batch_tile(batch, seq_len, dim, hidden, vmem_limit, multi_tc,
                     max_unroll=8):
    """Largest batch tile whose lane width (bt*N) is 128-aligned (or spans the
    full batch), fits the VMEM budget, and (on 2-TC chips) still leaves >= 2
    grid steps when possible."""
    cands_all = [d for d in range(1, batch + 1)
                 if batch % d == 0 and ((d * seq_len) % 128 == 0 or d == batch)]
    cands = [d for d in cands_all if d <= max_unroll] or [min(cands_all)]

    def est_bytes(d):
        slab = d * seq_len
        # double-buffered in/out blocks + qkv / cast temporaries (rough, f32)
        return 4 * (4 * dim * slab + 5 * 3 * hidden * slab)

    fitting = [d for d in cands if est_bytes(d) <= vmem_limit // 2]
    pool = fitting or [min(cands)]
    if multi_tc:
        two_step = [d for d in pool if batch // d >= 2]
        if two_step:
            pool = two_step
    return max(pool)


def linear_attention(x, w_qkv, w_out, b_out, *, heads=4, dim_head=32,
                     batch_tile=None, mxu_dtype=jnp.bfloat16):
    """x: (B, dim, N); w_qkv: (3*hidden, dim, 1); w_out: (dim, hidden, 1); b_out: (dim,)."""
    bsz, c, n = x.shape
    hidden = heads * dim_head
    assert w_qkv.shape == (3 * hidden, c, 1)
    assert w_out.shape == (c, hidden, 1)
    scale = float(dim_head) ** -0.5

    vmem_limit, multi_tc = _tpu_budget()
    bt = batch_tile if batch_tile is not None else _pick_batch_tile(
        bsz, n, c, hidden, vmem_limit, multi_tc)
    assert bsz % bt == 0

    # 1x1-conv weights as plain matrices; fold the q scale into the weight rows.
    w_qkv2 = w_qkv.reshape(3 * hidden, c)
    row_scale = jnp.concatenate(
        [jnp.full((hidden, 1), scale, dtype=w_qkv2.dtype),
         jnp.ones((2 * hidden, 1), dtype=w_qkv2.dtype)], axis=0)
    w_qkv2 = (w_qkv2 * row_scale).astype(mxu_dtype)
    w_out2 = w_out.reshape(c, hidden).astype(mxu_dtype)
    b_out2 = b_out.reshape(c, 1).astype(jnp.float32)

    # Block-diagonal head mask, built once outside the kernel (hoisted).
    hidx = jnp.arange(hidden) // dim_head
    head_mask = (hidx[:, None] == hidx[None, :]).astype(jnp.float32)

    # Channels-major slab: lanes hold (batch, sequence), so every matmul and
    # the output store in the kernel are lane-dense (bt*N wide).
    x_cm = jnp.transpose(x, (1, 0, 2)).reshape(c, bsz * n)

    kernel = functools.partial(
        linear_attention_kernel, hidden=hidden, batch_tile=bt, seq_len=n,
        mxu_dtype=mxu_dtype)

    out_cm = pl.pallas_call(
        kernel,
        out_shape=jax.ShapeDtypeStruct((c, bsz * n), x.dtype),
        grid=(bsz // bt,),
        in_specs=[
            pl.BlockSpec((c, bt * n), lambda i: (0, i)),
            pl.BlockSpec((3 * hidden, c), lambda i: (0, 0)),
            pl.BlockSpec((c, hidden), lambda i: (0, 0)),
            pl.BlockSpec((c, 1), lambda i: (0, 0)),
            pl.BlockSpec((hidden, hidden), lambda i: (0, 0)),
        ],
        out_specs=pl.BlockSpec((c, bt * n), lambda i: (0, i)),
        compiler_params=pltpu.CompilerParams(
            dimension_semantics=("parallel",),
            vmem_limit_bytes=vmem_limit,
        ),
    )(x_cm, w_qkv2, w_out2, b_out2, head_mask)

    return out_cm.reshape(c, bsz, n).transpose(1, 0, 2)


def reference_forward(x, w_qkv, w_out, b_out, *, heads=4, dim_head=32):
    """Pure-JAX reference matching PyTorch LinearAttention semantics."""
    bsz, c, n = x.shape
    hidden = heads * dim_head
    scale = float(dim_head) ** -0.5
    qkv = jnp.einsum('oc,bcn->bon', w_qkv.reshape(3 * hidden, c), x)
    q, k, v = jnp.split(qkv, 3, axis=1)
    q = q.reshape(bsz, heads, dim_head, n) * scale
    k = jax.nn.softmax(k.reshape(bsz, heads, dim_head, n), axis=-1)
    v = v.reshape(bsz, heads, dim_head, n)
    context = jnp.einsum('bhdn,bhen->bhde', k, v)
    out = jnp.einsum('bhde,bhdn->bhen', context, q).reshape(bsz, hidden, n)
    return jnp.einsum('oc,bcn->bon', w_out.reshape(c, hidden), out) + b_out[None, :, None]


if __name__ == "__main__":
    B, DIM, N, HEADS, DIM_HEAD = 2, 32, 16, 4, 32
    HIDDEN = HEADS * DIM_HEAD

    key = jax.random.PRNGKey(0)
    kx, kq, ko, kb = jax.random.split(key, 4)
    x = jax.random.normal(kx, (B, DIM, N), dtype=jnp.float32)
    w_qkv = jax.random.normal(kq, (3 * HIDDEN, DIM, 1), dtype=jnp.float32) * 0.1
    w_out = jax.random.normal(ko, (DIM, HIDDEN, 1), dtype=jnp.float32) * 0.1
    b_out = jax.random.normal(kb, (DIM,), dtype=jnp.float32) * 0.1

    ref = reference_forward(x, w_qkv, w_out, b_out, heads=HEADS, dim_head=DIM_HEAD)

    # Exact path: f32-fed MXU, tight tolerance.
    out_f32 = linear_attention(x, w_qkv, w_out, b_out, heads=HEADS,
                               dim_head=DIM_HEAD, mxu_dtype=jnp.float32)
    out_f32 = jax.block_until_ready(out_f32)
    assert out_f32.shape == (B, DIM, N)
    assert jnp.allclose(out_f32, ref, atol=1e-4, rtol=1e-4), "f32 mismatch vs reference"

    # Fast path: bf16-fed MXU (f32 accumulation), looser tolerance.
    out_bf16 = linear_attention(x, w_qkv, w_out, b_out, heads=HEADS,
                                dim_head=DIM_HEAD, mxu_dtype=jnp.bfloat16)
    out_bf16 = jax.block_until_ready(out_bf16)
    assert out_bf16.shape == (B, DIM, N)
    assert jnp.allclose(out_bf16, ref, atol=3e-2, rtol=3e-2), "bf16 mismatch vs reference"

    print("KERNEL_OK")
</pallas_src>

<mosaic_0001>
module attributes {stable_mosaic.version = 11 : i64} {
  func.func @linear_attention_kernel(%arg0: i32, %arg1: memref<32x32xf32, #tpu.memory_space<vmem>>, %arg2: memref<384x32xf32, #tpu.memory_space<vmem>>, %arg3: memref<32x128xf32, #tpu.memory_space<vmem>>, %arg4: memref<32x1xf32, #tpu.memory_space<vmem>>, %arg5: memref<128x128xf32, #tpu.memory_space<vmem>>, %arg6: memref<32x32xf32, #tpu.memory_space<vmem>>) attributes {dimension_semantics = [#tpu.dimension_semantics<parallel>], iteration_bounds = array<i64: 1>, scalar_prefetch = 0 : i64, scratch_operands = 0 : i64, tpu.core_type = #tpu.core_type<tc>, window_params = [{transform_indices = @transform_0, window_bounds = array<i64: 32, 32>}, {pipeline_mode = #tpu.pipeline_mode<synchronous>, transform_indices = @transform_1, window_bounds = array<i64: 384, 32>}, {pipeline_mode = #tpu.pipeline_mode<synchronous>, transform_indices = @transform_2, window_bounds = array<i64: 32, 128>}, {pipeline_mode = #tpu.pipeline_mode<synchronous>, transform_indices = @transform_3, window_bounds = array<i64: 32, 1>}, {pipeline_mode = #tpu.pipeline_mode<synchronous>, transform_indices = @transform_4, window_bounds = array<i64: 128, 128>}, {transform_indices = @transform_5, window_bounds = array<i64: 32, 32>}]} {
    %c0 = arith.constant 0 : index
    %c0_0 = arith.constant 0 : index
    %0 = vector.load %arg2[%c0, %c0_0] : memref<384x32xf32, #tpu.memory_space<vmem>>, vector<384x32xf32>
    %c0_1 = arith.constant 0 : index
    %c0_2 = arith.constant 0 : index
    %1 = vector.load %arg3[%c0_1, %c0_2] : memref<32x128xf32, #tpu.memory_space<vmem>>, vector<32x128xf32>
    %c0_3 = arith.constant 0 : index
    %c0_4 = arith.constant 0 : index
    %2 = vector.load %arg4[%c0_3, %c0_4] : memref<32x1xf32, #tpu.memory_space<vmem>>, vector<32x1xf32>
    %c0_5 = arith.constant 0 : index
    %c0_6 = arith.constant 0 : index
    %3 = vector.load %arg5[%c0_5, %c0_6] : memref<128x128xf32, #tpu.memory_space<vmem>>, vector<128x128xf32>
    %c0_7 = arith.constant 0 : index
    %c0_8 = arith.constant 0 : index
    %4 = vector.load %arg1[%c0_7, %c0_8] : memref<32x32xf32, #tpu.memory_space<vmem>>, vector<32x32xf32>
    %cst = arith.constant dense<0.000000e+00> : vector<384x32xf32>
    %5 = tpu.matmul %0, %4, %cst {dimension_numbers = #tpu.dot_dimension_numbers<[1], [0], [0], [1], [0, 0, 1, 1], [], []>} : vector<384x32xf32>, vector<32x32xf32>, vector<384x32xf32> -> vector<384x32xf32>
    %6 = vector.extract_strided_slice %5 {offsets = [0, 0], sizes = [128, 16], strides = [1, 1]} : vector<384x32xf32> to vector<128x16xf32>
    %7 = vector.extract_strided_slice %5 {offsets = [128, 0], sizes = [128, 16], strides = [1, 1]} : vector<384x32xf32> to vector<128x16xf32>
    %8 = vector.extract_strided_slice %5 {offsets = [256, 0], sizes = [128, 16], strides = [1, 1]} : vector<384x32xf32> to vector<128x16xf32>
    %cst_9 = arith.constant dense<0xFF800000> : vector<128xf32>
    %9 = vector.multi_reduction <maximumf>, %7, %cst_9 [1] : vector<128x16xf32> to vector<128xf32>
    %10 = vector.shape_cast %9 : vector<128xf32> to vector<128x1xf32>
    %11 = vector.broadcast %10 : vector<128x1xf32> to vector<128x16xf32>
    %12 = arith.subf %7, %11 : vector<128x16xf32>
    %13 = math.exp %12 : vector<128x16xf32>
    %cst_10 = arith.constant dense<0.000000e+00> : vector<128xf32>
    %14 = vector.multi_reduction <add>, %13, %cst_10 [1] : vector<128x16xf32> to vector<128xf32>
    %15 = vector.shape_cast %14 : vector<128xf32> to vector<128x1xf32>
    %16 = tpu.reciprocal %15 : vector<128x1xf32> -> vector<128x1xf32>
    %cst_11 = arith.constant dense<0.000000e+00> : vector<128x128xf32>
    %17 = tpu.matmul %13, %8, %cst_11 {dimension_numbers = #tpu.dot_dimension_numbers<[1], [1], [0], [0], [0, 0, 1, 0], [], []>} : vector<128x16xf32>, vector<128x16xf32>, vector<128x128xf32> -> vector<128x128xf32>
    %18 = arith.mulf %17, %3 : vector<128x128xf32>
    %19 = vector.broadcast %16 : vector<128x1xf32> to vector<128x128xf32>
    %20 = arith.mulf %18, %19 : vector<128x128xf32>
    %cst_12 = arith.constant dense<0.000000e+00> : vector<32x128xf32>
    %21 = tpu.matmul %1, %20, %cst_12 {dimension_numbers = #tpu.dot_dimension_numbers<[1], [1], [0], [0], [0, 0, 1, 0], [], []>} : vector<32x128xf32>, vector<128x128xf32>, vector<32x128xf32> -> vector<32x128xf32>
    %cst_13 = arith.constant dense<0.000000e+00> : vector<32x16xf32>
    %22 = tpu.matmul %21, %6, %cst_13 {dimension_numbers = #tpu.dot_dimension_numbers<[1], [0], [0], [1], [0, 0, 1, 1], [], []>} : vector<32x128xf32>, vector<128x16xf32>, vector<32x16xf32> -> vector<32x16xf32>
    %23 = vector.broadcast %2 : vector<32x1xf32> to vector<32x16xf32>
    %24 = arith.addf %22, %23 : vector<32x16xf32>
    %25 = vector.extract_strided_slice %5 {offsets = [0, 16], sizes = [128, 16], strides = [1, 1]} : vector<384x32xf32> to vector<128x16xf32>
    %26 = vector.extract_strided_slice %5 {offsets = [128, 16], sizes = [128, 16], strides = [1, 1]} : vector<384x32xf32> to vector<128x16xf32>
    %27 = vector.extract_strided_slice %5 {offsets = [256, 16], sizes = [128, 16], strides = [1, 1]} : vector<384x32xf32> to vector<128x16xf32>
    %cst_14 = arith.constant dense<0xFF800000> : vector<128xf32>
    %28 = vector.multi_reduction <maximumf>, %26, %cst_14 [1] : vector<128x16xf32> to vector<128xf32>
    %29 = vector.shape_cast %28 : vector<128xf32> to vector<128x1xf32>
    %30 = vector.broadcast %29 : vector<128x1xf32> to vector<128x16xf32>
    %31 = arith.subf %26, %30 : vector<128x16xf32>
    %32 = math.exp %31 : vector<128x16xf32>
    %cst_15 = arith.constant dense<0.000000e+00> : vector<128xf32>
    %33 = vector.multi_reduction <add>, %32, %cst_15 [1] : vector<128x16xf32> to vector<128xf32>
    %34 = vector.shape_cast %33 : vector<128xf32> to vector<128x1xf32>
    %35 = tpu.reciprocal %34 : vector<128x1xf32> -> vector<128x1xf32>
    %cst_16 = arith.constant dense<0.000000e+00> : vector<128x128xf32>
    %36 = tpu.matmul %32, %27, %cst_16 {dimension_numbers = #tpu.dot_dimension_numbers<[1], [1], [0], [0], [0, 0, 1, 0], [], []>} : vector<128x16xf32>, vector<128x16xf32>, vector<128x128xf32> -> vector<128x128xf32>
    %37 = arith.mulf %36, %3 : vector<128x128xf32>
    %38 = vector.broadcast %35 : vector<128x1xf32> to vector<128x128xf32>
    %39 = arith.mulf %37, %38 : vector<128x128xf32>
    %cst_17 = arith.constant dense<0.000000e+00> : vector<32x128xf32>
    %40 = tpu.matmul %1, %39, %cst_17 {dimension_numbers = #tpu.dot_dimension_numbers<[1], [1], [0], [0], [0, 0, 1, 0], [], []>} : vector<32x128xf32>, vector<128x128xf32>, vector<32x128xf32> -> vector<32x128xf32>
    %cst_18 = arith.constant dense<0.000000e+00> : vector<32x16xf32>
    %41 = tpu.matmul %40, %25, %cst_18 {dimension_numbers = #tpu.dot_dimension_numbers<[1], [0], [0], [1], [0, 0, 1, 1], [], []>} : vector<32x128xf32>, vector<128x16xf32>, vector<32x16xf32> -> vector<32x16xf32>
    %42 = vector.broadcast %2 : vector<32x1xf32> to vector<32x16xf32>
    %43 = arith.addf %41, %42 : vector<32x16xf32>
    %44 = tpu.concatenate %24, %43 in 1 : vector<32x16xf32>, vector<32x16xf32> -> vector<32x32xf32>
    %c0_19 = arith.constant 0 : index
    %c0_20 = arith.constant 0 : index
    %45 = vector.load %arg6[%c0_19, %c0_20] : memref<32x32xf32, #tpu.memory_space<vmem>>, vector<32x32xf32>
    tpu.vector_store %arg6[%c0_19, %c0_20], %44 {strides = array<i32>} : memref<32x32xf32, #tpu.memory_space<vmem>>, vector<32x32xf32>,
    return
  }
  func.func @transform_0(%arg0: i32) -> (i32, i32) {
    %c0_i32 = arith.constant 0 : i32
    %c0_i32_0 = arith.constant 0 : i32
    return %c0_i32, %arg0 : i32, i32
  }
  func.func @transform_1(%arg0: i32) -> (i32, i32) {
    %c0_i32 = arith.constant 0 : i32
    %c0_i32_0 = arith.constant 0 : i32
    %c0_i32_1 = arith.constant 0 : i32
    return %c0_i32, %c0_i32_0 : i32, i32
  }
  func.func @transform_2(%arg0: i32) -> (i32, i32) {
    %c0_i32 = arith.constant 0 : i32
    %c0_i32_0 = arith.constant 0 : i32
    %c0_i32_1 = arith.constant 0 : i32
    return %c0_i32, %c0_i32_0 : i32, i32
  }
  func.func @transform_3(%arg0: i32) -> (i32, i32) {
    %c0_i32 = arith.constant 0 : i32
    %c0_i32_0 = arith.constant 0 : i32
    %c0_i32_1 = arith.constant 0 : i32
    return %c0_i32, %c0_i32_0 : i32, i32
  }
  func.func @transform_4(%arg0: i32) -> (i32, i32) {
    %c0_i32 = arith.constant 0 : i32
    %c0_i32_0 = arith.constant 0 : i32
    %c0_i32_1 = arith.constant 0 : i32
    return %c0_i32, %c0_i32_0 : i32, i32
  }
  func.func @transform_5(%arg0: i32) -> (i32, i32) {
    %c0_i32 = arith.constant 0 : i32
    %c0_i32_0 = arith.constant 0 : i32
    return %c0_i32, %arg0 : i32, i32
  }
}

</mosaic_0001>

<bundles_post_ra>
// kernel: tpu_custom_call.1
= control target key start
LH: loop header
LB: loop body
LE: loop exit
PB: predicated region body
PF: predicated region fallthrough
CT: control target
= control target key end

     0   :  { %10 = vsyncpa [#allocation3], 0  ;;  %s4267_s0 = inlined_call_operand.hbm [shape: f32[32,32], index: 0, kind: input, shape index: {}]   ;;  %s4268_s1 = inlined_call_operand.hbm [shape: f32[384,32], index: 1, kind: input, shape index: {}]   ;;  %s4269_s2 = inlined_call_operand.hbm [shape: f32[32,128], index: 2, kind: input, shape index: {}]   ;;  %s4270_s3 = inlined_call_operand.hbm [shape: f32[32,1], index: 3, kind: input, shape index: {}]   ;;  %s4271_s4 = inlined_call_operand.hbm [shape: f32[128,128], index: 4, kind: input, shape index: {}]   ;;  %s4272_s5 = inlined_call_operand.hbm [shape: f32[32,32], index: 5, kind: output, shape index: {}]  }
   0x1   :  { %11 = vsyncpa [#allocation6], 0 }
   0x2   :  { %12 = vsyncpa [#allocation9], 0 }
   0x3   :  { %13 = vsyncpa [#allocation4], 0  ;;  %s3259_s18 = smov [#allocation5]   ;;  %s3260_s20 = smov [#allocation8]  }
   0x4   :  { %s31_s19 = sshll.u32 %s3259_s18, 4  ;;  %s55_s21 = sshll.u32 %s3260_s20, 4  ;;  %s32_s19 = int_to_ptr.vmem [resolvable:$true] %s31_s19  ;;  %s3300_s21 = int_to_ptr.vmem [resolvable:$true] %s55_s21 }
   0x5   :  { %s3119_s24 = scalar_lea.hbm %s4268_s1, 6144 }
   0x6   :  { %p3120_p0 = scmp.ne.s32.totalorder %s4268_s1, %s3119_s24  ;;  %p3123_p1 = scmp.lt.u32.totalorder %s3119_s24, %s4268_s1 }
   0x8   :  { %p3125_p2 = pnand %p3123_p1, %p3120_p0 }
   0xa   :  { %3128 = shalt.err (!%p3125_p2)
}
   0xb   :  { %s3129_s29 = scalar_lea.vmem %s32_s19, 6144  ;;  %p3134_p4 = scmp.lt.s32.totalorder %s32_s19, %s32_s19 }
   0xc   :  { %p3130_p3 = scmp.ne.s32.totalorder %s32_s19, %s3129_s29  ;;  %p3135_p5 = scmp.lt.s32.totalorder %s3129_s29, %s3129_s29 }
   0xe   :  { %p3136_p6 = por %p3135_p5, %p3134_p4 }
  0x10   :  { %p3137_p7 = pnand %p3136_p6, %p3130_p3 }
  0x12   :  { %3140 = shalt.err (!%p3137_p7)
}
  0x13   :  { %s3261_s30 = smov 128   ;;  %s3262_s6 = smov 8  }
  0x14   :  { %37 = dma.hbm_to_vmem [thread:$0]  %s4268_s1, 6144, %s32_s19, [#allocation6], %s3261_s30, %s3261_s30, %s3262_s6  }
  0x15   :  { %s3141_s11 = scalar_lea.hbm %s4270_s3, 512 }
  0x16   :  { %p3142_p8 = scmp.ne.s32.totalorder %s4270_s3, %s3141_s11  ;;  %p3145_p9 = scmp.lt.u32.totalorder %s3141_s11, %s4270_s3 }
  0x18   :  { %p3147_p10 = pnand %p3145_p9, %p3142_p8 }
  0x1a   :  { %3150 = shalt.err (!%p3147_p10)
}
  0x1b   :  { %s3151_s16 = scalar_lea.vmem %s3300_s21, 512  ;;  %p3156_p12 = scmp.lt.s32.totalorder %s3300_s21, %s3300_s21 }
  0x1c   :  { %p3152_p11 = scmp.ne.s32.totalorder %s3300_s21, %s3151_s16  ;;  %p3157_p13 = scmp.lt.s32.totalorder %s3151_s16, %s3151_s16 }
  0x1e   :  { %p3158_p0 = por %p3157_p13, %p3156_p12 }
  0x20   :  { %p3159_p1 = pnand %p3158_p0, %p3152_p11 }
  0x22   :  { %3162 = shalt.err (!%p3159_p1)
}
  0x23   :  { %61 = dma.hbm_to_vmem [thread:$0]  %s4270_s3, 512, %s3300_s21, [#allocation9], %s3261_s30, %s3261_s30, %s3262_s6  }
  0x24   :  { %s3263_s18 = smov [#allocation2]   ;;  %s3264_s20 = smov [#allocation7]  }
  0x25   :  { %s19_s19 = sshll.u32 %s3263_s18, 4  ;;  %s43_s22 = sshll.u32 %s3264_s20, 4  ;;  %s20_s19 = int_to_ptr.vmem [resolvable:$true] %s19_s19  ;;  %s3337_s22 = int_to_ptr.vmem [resolvable:$true] %s43_s22 }
  0x26   :  { %s3163_s25 = scalar_lea.hbm %s4267_s0, 512 }
  0x27   :  { %p3164_p2 = scmp.ne.s32.totalorder %s4267_s0, %s3163_s25  ;;  %p3167_p3 = scmp.lt.u32.totalorder %s3163_s25, %s4267_s0 }
  0x29   :  { %p3169_p4 = pnand %p3167_p3, %p3164_p2 }
  0x2b   :  { %3172 = shalt.err (!%p3169_p4)
}
  0x2c   :  { %s3173_s3 = scalar_lea.vmem %s20_s19, 512  ;;  %p3178_p6 = scmp.lt.s32.totalorder %s20_s19, %s20_s19 }
  0x2d   :  { %p3174_p5 = scmp.ne.s32.totalorder %s20_s19, %s3173_s3  ;;  %p3179_p7 = scmp.lt.s32.totalorder %s3173_s3, %s3173_s3 }
  0x2f   :  { %p3180_p8 = por %p3179_p7, %p3178_p6 }
  0x31   :  { %p3181_p9 = pnand %p3180_p8, %p3174_p5 }
  0x33   :  { %3184 = shalt.err (!%p3181_p9)
}
  0x34   :  { %25 = dma.hbm_to_vmem [thread:$0]  %s4267_s0, 512, %s20_s19, [#allocation3], %s3261_s30, %s3261_s30, %s3262_s6  }
  0x35   :  { %s3185_s10 = scalar_lea.hbm %s4269_s2, 512 }
  0x36   :  { %p3186_p10 = scmp.ne.s32.totalorder %s4269_s2, %s3185_s10  ;;  %p3189_p11 = scmp.lt.u32.totalorder %s3185_s10, %s4269_s2 }
  0x38   :  { %p3191_p12 = pnand %p3189_p11, %p3186_p10 }
  0x3a   :  { %3194 = shalt.err (!%p3191_p12)
}
  0x3b   :  { %s3195_s15 = scalar_lea.vmem %s3337_s22, 512  ;;  %p3200_p0 = scmp.lt.s32.totalorder %s3337_s22, %s3337_s22 }
  0x3c   :  { %p3196_p13 = scmp.ne.s32.totalorder %s3337_s22, %s3195_s15  ;;  %p3201_p1 = scmp.lt.s32.totalorder %s3195_s15, %s3195_s15 }
  0x3e   :  { %p3202_p2 = por %p3201_p1, %p3200_p0 }
  0x40   :  { %p3203_p3 = pnand %p3202_p2, %p3196_p13 }
  0x42   :  { %3206 = shalt.err (!%p3203_p3)
}
  0x43   :  { %49 = dma.hbm_to_vmem [thread:$0]  %s4269_s2, 512, %s3337_s22, [#allocation6], %s3261_s30, %s3261_s30, %s3262_s6  }
  0x44   :  { %s3265_s1 = smov [#allocation10]   ;;  %s3207_s20 = scalar_lea.hbm %s4271_s4, 2048 }
  0x45   :  { %s67_s17 = sshll.u32 %s3265_s1, 4  ;;  %p3208_p4 = scmp.ne.s32.totalorder %s4271_s4, %s3207_s20  ;;  %s68_s17 = int_to_ptr.vmem [resolvable:$true] %s67_s17 }
  0x46   :  { %p3211_p5 = scmp.lt.u32.totalorder %s3207_s20, %s4271_s4 }
  0x48   :  { %p3213_p6 = pnand %p3211_p5, %p3208_p4 }
  0x4a   :  { %3216 = shalt.err (!%p3213_p6)
}
  0x4b   :  { %s3217_s27 = scalar_lea.vmem %s68_s17, 2048  ;;  %p3222_p8 = scmp.lt.s32.totalorder %s68_s17, %s68_s17 }
  0x4c   :  { %p3218_p7 = scmp.ne.s32.totalorder %s68_s17, %s3217_s27  ;;  %p3223_p9 = scmp.lt.s32.totalorder %s3217_s27, %s3217_s27 }
  0x4e   :  { %p3224_p10 = por %p3223_p9, %p3222_p8 }
  0x50   :  { %p3225_p11 = pnand %p3224_p10, %p3218_p7 }
  0x52   :  { %3228 = shalt.err (!%p3225_p11)
}
  0x53   :  { %73 = dma.hbm_to_vmem [thread:$0]  %s4271_s4, 2048, %s68_s17, [#allocation9], %s3261_s30, %s3261_s30, %s3262_s6  }
  0x54   :  { %3251 = dma.done.wait [#allocation3], 512  }
  0x55   :  { %3252 = vsyncadd [#allocation3], 4294966784 }
  0x56   :  { %3253 = dma.done.wait [#allocation6], 6656  }
  0x57   :  { %3254 = vsyncadd [#allocation6], 4294960640 }
  0x58   :  { %3255 = dma.done.wait [#allocation9], 2560  }
  0x59   :  { %3256 = vsyncadd [#allocation9], 4294964736  ;;  %vm165_vm0 = vcmask 261120   ;;  %v161_v0 = vld [vmem:[#allocation2] sm:$0xff]  ;;  %v162_v1 = vld [vmem:[#allocation2 + $0x8] sm:$0xff]  ;;  %vm615_vm1 = vcmask 130048  }
  0x5a   :  { %v163_v2 = vld [vmem:[#allocation2 + $0x10] sm:$0xff]  ;;  %v2666_v3 = vpack.c.bf16 %v162_v1, %v161_v0  ;;  %v164_v4 = vld [vmem:[#allocation2 + $0x18] sm:$0xff]  ;;  %v89_v5 = vld [vmem:[#allocation5] sm:$0xff]  ;;  %vm1239_vm2 = vcmask 261248   ;;  %s3266_s4 = smov 112   ;;  %s3268_s28 = smov 16  }
  0x5b   :  { %v2670_v6 = vpack.c.bf16 %v164_v4, %v163_v2  ;;  %2330 = vmatprep.mubr.msk.f32.mxu0 %vm165_vm0, %v89_v5  ;;  %v90_v7 = vld [vmem:[#allocation5 + $0x8] sm:$0xff]  ;;  %v91_v8 = vld [vmem:[#allocation5 + $0x10] sm:$0xff]  ;;  %v92_v9 = vld [vmem:[#allocation5 + $0x18] sm:$0xff]  ;;  %s3269_s29 = smov [#allocation11]  }
  0x5c   :  { %2667 = vmatprep.subr.bf16.mxu0 %v2666_v3  ;;  %v93_v10 = vld [vmem:[#allocation5 + $0x20] sm:$0xff]  ;;  %v94_v11 = vld [vmem:[#allocation5 + $0x28] sm:$0xff]  ;;  %v95_v12 = vld [vmem:[#allocation5 + $0x30] sm:$0xff]  ;;  %s2000_s3 = sshll.u32 %s3269_s29, 4  ;;  %s2001_s3 = int_to_ptr.vmem [resolvable:$true] %s2000_s3 }
  0x5d   :  { %2669 = vmatpush3.bf16.msra.mxu0 %v2666_v3  ;;  %v96_v13 = vld [vmem:[#allocation5 + $0x38] sm:$0xff]  ;;  %v97_v14 = vld [vmem:[#allocation5 + $0x40] sm:$0xff]  ;;  %v98_v15 = vld [vmem:[#allocation5 + $0x48] sm:$0xff]  ;;  %s3229_s21 = scalar_lea.vmem %s2001_s3, 512  ;;  %p3234_p13 = scmp.lt.s32.totalorder %s2001_s3, %s2001_s3 }
  0x5e   :  { %2671 = vmatprep.subr.bf16.mxu0 %v2670_v6  ;;  %v99_v16 = vld [vmem:[#allocation5 + $0x50] sm:$0xff]  ;;  %v100_v17 = vld [vmem:[#allocation5 + $0x58] sm:$0xff]  ;;  %v101_v18 = vld [vmem:[#allocation5 + $0x60] sm:$0xff]  ;;  %p3230_p12 = scmp.ne.s32.totalorder %s2001_s3, %s3229_s21  ;;  %p3235_p0 = scmp.lt.s32.totalorder %s3229_s21, %s3229_s21 }
  0x5f   :  { %v102_v19 = vld [vmem:[#allocation5 + $0x68] sm:$0xff]  ;;  %v103_v20 = vld [vmem:[#allocation5 + $0x70] sm:$0xff]  ;;  %v104_v21 = vld [vmem:[#allocation5 + $0x78] sm:$0xff] }
  0x60   :  { %v105_v22 = vld [vmem:[#allocation5 + $0x80] sm:$0xff]  ;;  %v106_v23 = vld [vmem:[#allocation5 + $0x88] sm:$0xff]  ;;  %v107_v24 = vld [vmem:[#allocation5 + $0x90] sm:$0xff]  ;;  %p3236_p1 = por %p3235_p0, %p3234_p13 }
  0x61   :  { %2673 = vmatpush3.bf16.msra.mxu0 %v2670_v6  ;;  %v108_v25 = vld [vmem:[#allocation5 + $0x98] sm:$0xff]  ;;  %v109_v26 = vld [vmem:[#allocation5 + $0xa0] sm:$0xff]  ;;  %v110_v27 = vld [vmem:[#allocation5 + $0xa8] sm:$0xff] }
  0x62   :  { %v111_v28 = vld [vmem:[#allocation5 + $0xb0] sm:$0xff]  ;;  %v112_v29 = vld [vmem:[#allocation5 + $0xb8] sm:$0xff]  ;;  %v113_v30 = vld [vmem:[#allocation5 + $0xc0] sm:$0xff]  ;;  %p3237_p2 = pnand %p3236_p1, %p3230_p12 }
  0x63   :  { %v114_v31 = vld [vmem:[#allocation5 + $0xc8] sm:$0xff]  ;;  %v115_v32 = vld [vmem:[#allocation5 + $0xd0] sm:$0xff]  ;;  %v116_v33 = vld [vmem:[#allocation5 + $0xd8] sm:$0xff] }
  0x64   :  { %2331 = vmatmul.mubr.msk.f32.vlgmr.msra.gmra.mrb[0].mxu0 %vm165_vm0, %v90_v7  ;;  %v117_v34 = vld [vmem:[#allocation5 + $0xe0] sm:$0xff]  ;;  %v118_v35 = vld [vmem:[#allocation5 + $0xe8] sm:$0xff]  ;;  %v119_v36 = vld [vmem:[#allocation5 + $0xf0] sm:$0xff] }
  0x65   :  { %2333 = vmatprep.mubr.msk.f32.mxu0 %vm165_vm0, %v91_v8  ;;  %v120_v37 = vld [vmem:[#allocation5 + $0xf8] sm:$0xff]  ;;  %v121_v38 = vld [vmem:[#allocation5 + $0x100] sm:$0xff]  ;;  %v122_v39 = vld [vmem:[#allocation5 + $0x108] sm:$0xff] }
  0x66   :  { %v123_v40 = vld [vmem:[#allocation5 + $0x110] sm:$0xff]  ;;  %v124_v41 = vld [vmem:[#allocation5 + $0x118] sm:$0xff]  ;;  %v125_v42 = vld [vmem:[#allocation5 + $0x120] sm:$0xff] }
  0x67   :  { %v126_v43 = vld [vmem:[#allocation5 + $0x128] sm:$0xff]  ;;  %v127_v44 = vld [vmem:[#allocation5 + $0x130] sm:$0xff]  ;;  %v128_v45 = vld [vmem:[#allocation5 + $0x138] sm:$0xff] }
  0x68   :  { %2334 = vmatmul.mubr.msk.f32.gmra.mrb[2].mxu0 %vm165_vm0, %v92_v9  ;;  %v129_v46 = vld [vmem:[#allocation5 + $0x140] sm:$0xff]  ;;  %v130_v47 = vld [vmem:[#allocation5 + $0x148] sm:$0xff]  ;;  %v131_v48 = vld [vmem:[#allocation5 + $0x150] sm:$0xff] }
  0x69   :  { %2336 = vmatprep.mubr.msk.f32.mxu0 %vm165_vm0, %v93_v10  ;;  %v132_v49 = vld [vmem:[#allocation5 + $0x158] sm:$0xff]  ;;  %v133_v50 = vld [vmem:[#allocation5 + $0x160] sm:$0xff]  ;;  %v134_v51 = vld [vmem:[#allocation5 + $0x168] sm:$0xff] }
  0x6a   :  { %v135_v52 = vld [vmem:[#allocation5 + $0x170] sm:$0xff]  ;;  %v136_v53 = vld [vmem:[#allocation5 + $0x178] sm:$0xff]  ;;  %vm3615_vm3 = vmpackc.low %vm615_vm1, %vm615_vm1 }
  0x6c   :  { %2337 = vmatmul.mubr.msk.f32.gmra.mrb[4].mxu0 %vm165_vm0, %v94_v11 }
  0x6d   :  { %2339 = vmatprep.mubr.msk.f32.mxu0 %vm165_vm0, %v95_v12 }
  0x70   :  { %2340 = vmatmul.mubr.msk.f32.gmra.mrb[6].mxu0 %vm165_vm0, %v96_v13 }
  0x71   :  { %2342 = vmatprep.mubr.msk.f32.mxu0 %vm165_vm0, %v97_v14 }
  0x74   :  { %2343 = vmatmul.mubr.msk.f32.gmra.mrb[8].mxu0 %vm165_vm0, %v98_v15 }
  0x75   :  { %2345 = vmatprep.mubr.msk.f32.mxu0 %vm165_vm0, %v99_v16 }
  0x78   :  { %2346 = vmatmul.mubr.msk.f32.gmra.mrb[10].mxu0 %vm165_vm0, %v100_v17 }
  0x79   :  { %2348 = vmatprep.mubr.msk.f32.mxu0 %vm165_vm0, %v101_v18 }
  0x7c   :  { %2349 = vmatmul.mubr.msk.f32.gmra.mrb[12].mxu0 %vm165_vm0, %v102_v19 }
  0x7d   :  { %2351 = vmatprep.mubr.msk.f32.mxu0 %vm165_vm0, %v103_v20 }
  0x80   :  { %2352 = vmatmul.mubr.msk.f32.gmra.mrb[14].mxu0 %vm165_vm0, %v104_v21 }
  0x81   :  { %2354 = vmatprep.mubr.msk.f32.mxu0 %vm165_vm0, %v105_v22 }
  0x84   :  { %2355 = vmatmul.mubr.msk.f32.gmra.mrb[16].mxu0 %vm165_vm0, %v106_v23 }
  0x85   :  { %2357 = vmatprep.mubr.msk.f32.mxu0 %vm165_vm0, %v107_v24 }
  0x88   :  { %2358 = vmatmul.mubr.msk.f32.gmra.mrb[18].mxu0 %vm165_vm0, %v108_v25 }
  0x89   :  { %2360 = vmatprep.mubr.msk.f32.mxu0 %vm165_vm0, %v109_v26 }
  0x8c   :  { %2361 = vmatmul.mubr.msk.f32.gmra.mrb[20].mxu0 %vm165_vm0, %v110_v27 }
  0x8d   :  { %2363 = vmatprep.mubr.msk.f32.mxu0 %vm165_vm0, %v111_v28 }
  0x90   :  { %2364 = vmatmul.mubr.msk.f32.gmra.mrb[22].mxu0 %vm165_vm0, %v112_v29 }
  0x91   :  { %2366 = vmatprep.mubr.msk.f32.mxu0 %vm165_vm0, %v113_v30 }
  0x94   :  { %2367 = vmatmul.mubr.msk.f32.gmra.mrb[24].mxu0 %vm165_vm0, %v114_v31 }
  0x95   :  { %2369 = vmatprep.mubr.msk.f32.mxu0 %vm165_vm0, %v115_v32 }
  0x98   :  { %2370 = vmatmul.mubr.msk.f32.gmra.mrb[26].mxu0 %vm165_vm0, %v116_v33 }
  0x99   :  { %2372 = vmatprep.mubr.msk.f32.mxu0 %vm165_vm0, %v117_v34 }
  0x9c   :  { %2373 = vmatmul.mubr.msk.f32.gmra.mrb[28].mxu0 %vm165_vm0, %v118_v35 }
  0x9d   :  { %2375 = vmatprep.mubr.msk.f32.mxu0 %vm165_vm0, %v119_v36 }
  0xa0   :  { %2376 = vmatmul.mubr.msk.f32.gmra.mrb[30].mxu0 %vm165_vm0, %v120_v37 }
  0xa1   :  { %2378 = vmatprep.mubr.msk.f32.mxu0 %vm165_vm0, %v121_v38 }
  0xa4   :  { %2379 = vmatmul.mubr.msk.f32.gmra.mrb[32].mxu0 %vm165_vm0, %v122_v39 }
  0xa5   :  { %2381 = vmatprep.mubr.msk.f32.mxu0 %vm165_vm0, %v123_v40 }
  0xa8   :  { %2382 = vmatmul.mubr.msk.f32.gmra.mrb[34].mxu0 %vm165_vm0, %v124_v41 }
  0xa9   :  { %2384 = vmatprep.mubr.msk.f32.mxu0 %vm165_vm0, %v125_v42 }
  0xac   :  { %2385 = vmatmul.mubr.msk.f32.gmra.mrb[36].mxu0 %vm165_vm0, %v126_v43 }
  0xad   :  { %2387 = vmatprep.mubr.msk.f32.mxu0 %vm165_vm0, %v127_v44 }
  0xb0   :  { %2388 = vmatmul.mubr.msk.f32.gmra.mrb[38].mxu0 %vm165_vm0, %v128_v45 }
  0xb1   :  { %2390 = vmatprep.mubr.msk.f32.mxu0 %vm165_vm0, %v129_v46 }
  0xb4   :  { %2391 = vmatmul.mubr.msk.f32.gmra.mrb[40].mxu0 %vm165_vm0, %v130_v47 }
  0xb5   :  { %2393 = vmatprep.mubr.msk.f32.mxu0 %vm165_vm0, %v131_v48 }
  0xb8   :  { %2394 = vmatmul.mubr.msk.f32.gmra.mrb[42].mxu0 %vm165_vm0, %v132_v49 }
  0xb9   :  { %2396 = vmatprep.mubr.msk.f32.mxu0 %vm165_vm0, %v133_v50 }
  0xbc   :  { %2397 = vmatmul.mubr.msk.f32.gmra.mrb[44].mxu0 %vm165_vm0, %v134_v51 }
  0xbd   :  { %2399 = vmatprep.mubr.msk.f32.mxu0 %vm165_vm0, %v135_v52 }
  0xc0   :  { %2400 = vmatmul.mubr.msk.f32.gmra.mrb[46].mxu0 %vm165_vm0, %v136_v53 }
 0x137   :  { %v3437_v54 = vpop.f32.mrb[0].mxu0 }
 0x138   :  { %4288 = vst [vmem:[#allocation16_spill] sm:$0xff] %v3437_v54  ;;  %v3439_v55 = vpop.f32.mrb[1].mxu0 }
 0x139   :  { %4289 = vst [vmem:[#allocation17_spill] sm:$0xff] %v3439_v55  ;;  %v3445_v57 = vpack.c.bf16 %v3437_v54, %v3439_v55 }
 0x13b   :  { %v3447_v58 = vpop.f32.mrb[2].mxu0 }
 0x13c   :  { %v3449_v59 = vpop.f32.mrb[3].mxu0 }
 0x13d   :  { %4290 = vst [vmem:[#allocation18_spill] sm:$0xff] %v3449_v59  ;;  %v3455_v61 = vpack.c.bf16 %v3447_v58, %v3449_v59 }
 0x13f   :  { %v3457_v62 = vpop.f32.mrb[4].mxu0 }
 0x140   :  { %4291 = vst [vmem:[#allocation19_spill] sm:$0xff] %v3457_v62  ;;  %v3459_v63 = vpop.f32.mrb[5].mxu0 }
 0x141   :  { %4292 = vst [vmem:[#allocation20_spill] sm:$0xff] %v3459_v63  ;;  %v3465_v1 = vpack.c.bf16 %v3457_v62, %v3459_v63 }
 0x143   :  { %v3467_v2 = vpop.f32.mrb[6].mxu0 }
 0x144   :  { %4293 = vst [vmem:[#allocation21_spill] sm:$0xff] %v3467_v2  ;;  %v3469_v3 = vpop.f32.mrb[7].mxu0 }
 0x145   :  { %4294 = vst [vmem:[#allocation22_spill] sm:$0xff] %v3469_v3  ;;  %v3475_v5 = vpack.c.bf16 %v3467_v2, %v3469_v3 }
 0x147   :  { %v3477_v6 = vpop.f32.mrb[8].mxu0 }
 0x148   :  { %4295 = vst [vmem:[#allocation23_spill] sm:$0xff] %v3477_v6  ;;  %v3479_v7 = vpop.f32.mrb[9].mxu0 }
 0x149   :  { %4296 = vst [vmem:[#allocation24_spill] sm:$0xff] %v3479_v7  ;;  %v3485_v9 = vpack.c.bf16 %v3477_v6, %v3479_v7 }
 0x14b   :  { %v3487_v10 = vpop.f32.mrb[10].mxu0 }
 0x14c   :  { %4297 = vst [vmem:[#allocation25_spill] sm:$0xff] %v3487_v10  ;;  %v3489_v11 = vpop.f32.mrb[11].mxu0 }
 0x14d   :  { %4298 = vst [vmem:[#allocation26_spill] sm:$0xff] %v3489_v11  ;;  %v3495_v13 = vpack.c.bf16 %v3487_v10, %v3489_v11 }
 0x14f   :  { %v3497_v14 = vpop.f32.mrb[12].mxu0 }
 0x150   :  { %4299 = vst [vmem:[#allocation27_spill] sm:$0xff] %v3497_v14  ;;  %v3499_v15 = vpop.f32.mrb[13].mxu0 }
 0x151   :  { %4300 = vst [vmem:[#allocation28_spill] sm:$0xff] %v3499_v15  ;;  %v3505_v17 = vpack.c.bf16 %v3497_v14, %v3499_v15 }
 0x153   :  { %v3507_v18 = vpop.f32.mrb[14].mxu0 }
 0x154   :  { %4301 = vst [vmem:[#allocation29_spill] sm:$0xff] %v3507_v18  ;;  %v3509_v19 = vpop.f32.mrb[15].mxu0 }
 0x155   :  { %4302 = vst [vmem:[#allocation30_spill] sm:$0xff] %v3509_v19  ;;  %v3515_v21 = vpack.c.bf16 %v3507_v18, %v3509_v19 }
 0x157   :  { %v3517_v22 = vpop.f32.mrb[16].mxu0 }
 0x158   :  { %v3519_v23 = vpop.f32.mrb[17].mxu0  ;;  %v619_v27 = vsel %vm615_vm1, %v3517_v22, -inf }
 0x159   :  { %v616_v24 = vsel %vm615_vm1, %v3519_v23, -inf }
 0x15a   :  { %617 = vmax.xlane.f32.xlu0 %v616_v24 }
 0x15b   :  { %v3523_v25 = vpop.f32.mrb[18].mxu0 }
 0x15c   :  { %v3525_v26 = vpop.f32.mrb[19].mxu0  ;;  %v625_v30 = vsel %vm615_vm1, %v3523_v25, -inf }
 0x15d   :  { %v622_v28 = vsel %vm615_vm1, %v3525_v26, -inf }
 0x15e   :  { %620 = vmax.xlane.f32.xlu0 %v619_v27  ;;  %623 = vmax.xlane.f32.xlu1 %v622_v28 }
 0x15f   :  { %v3531_v29 = vpop.f32.mrb[20].mxu0 }
 0x160   :  { %v3535_v31 = vpop.f32.mrb[21].mxu0  ;;  %v631_v34 = vsel %vm615_vm1, %v3531_v29, -inf }
 0x161   :  { %v628_v32 = vsel %vm615_vm1, %v3535_v31, -inf }
 0x162   :  { %626 = vmax.xlane.f32.xlu1 %v625_v30  ;;  %629 = vmax.xlane.f32.xlu0 %v628_v32 }
 0x163   :  { %v3539_v33 = vpop.f32.mrb[22].mxu0 }
 0x164   :  { %v3543_v35 = vpop.f32.mrb[23].mxu0  ;;  %v637_v38 = vsel %vm615_vm1, %v3539_v33, -inf }
 0x165   :  { %v634_v36 = vsel %vm615_vm1, %v3543_v35, -inf }
 0x166   :  { %632 = vmax.xlane.f32.xlu1 %v631_v34  ;;  %635 = vmax.xlane.f32.xlu0 %v634_v36 }
 0x167   :  { %v3547_v37 = vpop.f32.mrb[24].mxu0 }
 0x168   :  { %v3551_v39 = vpop.f32.mrb[25].mxu0  ;;  %v3555_v40 = vsel %vm1239_vm2, %v3547_v37, -inf  ;;  %v643_v43 = vsel %vm615_vm1, %v3547_v37, -inf }
 0x169   :  { %v640_v41 = vsel %vm615_vm1, %v3551_v39, -inf }
 0x16a   :  { %638 = vmax.xlane.f32.xlu1 %v637_v38  ;;  %641 = vmax.xlane.f32.xlu0 %v640_v41 }
 0x16b   :  { %v3559_v42 = vpop.f32.mrb[26].mxu0 }
 0x16c   :  { %v3563_v44 = vpop.f32.mrb[27].mxu0  ;;  %v3567_v45 = vsel %vm1239_vm2, %v3559_v42, -inf  ;;  %v649_v49 = vsel %vm615_vm1, %v3559_v42, -inf }
 0x16d   :  { %v646_v46 = vsel %vm615_vm1, %v3563_v44, -inf  ;;  %v3573_v47 = vsel %vm1239_vm2, %v3563_v44, -inf }
 0x16e   :  { %644 = vmax.xlane.f32.xlu1 %v643_v43  ;;  %647 = vmax.xlane.f32.xlu0 %v646_v46 }
 0x16f   :  { %v3575_v48 = vpop.f32.mrb[28].mxu0 }
 0x170   :  { %v3579_v50 = vpop.f32.mrb[29].mxu0  ;;  %v3583_v51 = vsel %vm1239_vm2, %v3575_v48, -inf  ;;  %v655_v27 = vsel %vm615_vm1, %v3575_v48, -inf }
 0x171   :  { %v652_v52 = vsel %vm615_vm1, %v3579_v50, -inf  ;;  %v3589_v53 = vsel %vm1239_vm2, %v3579_v50, -inf }
 0x172   :  { %650 = vmax.xlane.f32.xlu1 %v649_v49  ;;  %653 = vmax.xlane.f32.xlu0 %v652_v52 }
 0x173   :  { %v3591_v24 = vpop.f32.mrb[30].mxu0 }
 0x174   :  { %v3595_v28 = vpop.f32.mrb[31].mxu0  ;;  %v3599_v30 = vsel %vm1239_vm2, %v3591_v24, -inf  ;;  %v661_v38 = vsel %vm615_vm1, %v3591_v24, -inf }
 0x175   :  { %v658_v32 = vsel %vm615_vm1, %v3595_v28, -inf  ;;  %v3605_v34 = vsel %vm1239_vm2, %v3595_v28, -inf }
 0x176   :  { %656 = vmax.xlane.f32.xlu1 %v655_v27  ;;  %659 = vmax.xlane.f32.xlu0 %v658_v32 }
 0x177   :  { %v3607_v36 = vpop.f32.mrb[32].mxu0 }
 0x178   :  { %v3611_v41 = vpop.f32.mrb[33].mxu0 }
 0x179   :  { %v2674_v49 = vpack.c.bf16 %v3607_v36, %v3611_v41 }
 0x17a   :  { %662 = vmax.xlane.f32.xlu1 %v661_v38 }
 0x17b   :  { %2676 = vmatprep.subr.msk.bf16.mxu1 %vm3615_vm3, %v2674_v49  ;;  %v3625_v52 = vpop.f32.mrb[34].mxu0 }
 0x17c   :  { %2679 = vmatpush3.bf16.xpose.msk.msra.mxu1 %vm3615_vm3, %v2674_v49  ;;  %v3629_v27 = vpop.f32.mrb[35].mxu0 }
 0x17d   :  { %v2680_v20 = vpack.c.bf16 %v3625_v52, %v3629_v27 }
 0x17f   :  { %2682 = vmatprep.subr.msk.bf16.mxu1 %vm3615_vm3, %v2680_v20  ;;  %v3637_v38 = vpop.f32.mrb[36].mxu0 }
 0x180   :  { %v3639_v12 = vpop.f32.mrb[37].mxu0 }
 0x181   :  { %v2686_v49 = vpack.c.bf16 %v3637_v38, %v3639_v12 }
 0x183   :  { %v3645_v4 = vpop.f32.mrb[38].mxu0 }
 0x184   :  { %2685 = vmatpush3.bf16.xpose.msk.msra.mxu1 %vm3615_vm3, %v2680_v20  ;;  %v3649_v8 = vpop.f32.mrb[39].mxu0 }
 0x185   :  { %2688 = vmatprep.subr.msk.bf16.mxu1 %vm3615_vm3, %v2686_v49  ;;  %v2692_v56 = vpack.c.bf16 %v3645_v4, %v3649_v8 }
 0x187   :  { %v3657_v60 = vpop.f32.mrb[40].mxu0 }
 0x188   :  { %v3659_v16 = vpop.f32.mrb[41].mxu0 }
 0x189   :  { %v2698_v20 = vpack.c.bf16 %v3657_v60, %v3659_v16 }
 0x18b   :  { %v3665_v46 = vpop.f32.mrb[42].mxu0 }
 0x18c   :  { %2691 = vmatpush3.bf16.xpose.msk.msra.mxu1 %vm3615_vm3, %v2686_v49  ;;  %v3669_v19 = vpop.f32.mrb[43].mxu0 }
 0x18d   :  { %2694 = vmatprep.subr.msk.bf16.mxu1 %vm3615_vm3, %v2692_v56  ;;  %v2704_v18 = vpack.c.bf16 %v3665_v46, %v3669_v19 }
 0x18f   :  { %v3677_v32 = vpop.f32.mrb[44].mxu0 }
 0x190   :  { %v3679_v11 = vpop.f32.mrb[45].mxu0 }
 0x191   :  { %v2710_v49 = vpack.c.bf16 %v3677_v32, %v3679_v11 }
 0x193   :  { %v3685_v15 = vpop.f32.mrb[46].mxu0 }
 0x194   :  { %2697 = vmatpush3.bf16.xpose.msk.msra.mxu1 %vm3615_vm3, %v2692_v56  ;;  %v3689_v14 = vpop.f32.mrb[47].mxu0 }
 0x195   :  { %2700 = vmatprep.subr.msk.bf16.mxu1 %vm3615_vm3, %v2698_v20  ;;  %v2716_v3 = vpack.c.bf16 %v3685_v15, %v3689_v14 }
 0x19c   :  { %2703 = vmatpush3.bf16.xpose.msk.msra.mxu1 %vm3615_vm3, %v2698_v20 }
 0x19d   :  { %2706 = vmatprep.subr.msk.bf16.mxu1 %vm3615_vm3, %v2704_v18 }
 0x1a4   :  { %2709 = vmatpush3.bf16.xpose.msk.msra.mxu1 %vm3615_vm3, %v2704_v18 }
 0x1a5   :  { %2712 = vmatprep.subr.msk.bf16.mxu1 %vm3615_vm3, %v2710_v49 }
 0x1ac   :  { %2715 = vmatpush3.bf16.xpose.msk.msra.mxu1 %vm3615_vm3, %v2710_v49 }
 0x1ad   :  { %2718 = vmatprep.subr.msk.bf16.mxu1 %vm3615_vm3, %v2716_v3 }
 0x1b4   :  { %2721 = vmatpush3.bf16.xpose.msk.msra.mxu1 %vm3615_vm3, %v2716_v3 }
 0x1b5   :  { %2755 = vmatprep.subr.bf16.mxu1 %v3445_v57 }
 0x1e7   :  { %v618_v56 = vpop.xlane.xlu0 %617 }
 0x1e8   :  { %v664_v20 = vsub.f32 %v3519_v23, %v618_v56 }
 0x1ea   :  { %v680_v10 = vmul.f32 1.442695, %v664_v20 }
 0x1eb   :  { %v621_v0 = vpop.xlane.xlu0 %620  ;;  %v624_v18 = vpop.xlane.xlu1 %623 }
 0x1ec   :  { %2991 = vpow2.f32 %v680_v10  ;;  %v665_v2 = vsub.f32 %v3517_v22, %v621_v0  ;;  %v666_v7 = vsub.f32 %v3525_v26, %v624_v18 }
 0x1ee   :  { %v682_v49 = vmul.f32 1.442695, %v665_v2  ;;  %v684_v6 = vmul.f32 1.442695, %v666_v7 }
 0x1ef   :  { %v627_v63 = vpop.xlane.xlu1 %626  ;;  %v630_v62 = vpop.xlane.xlu0 %629 }
 0x1f0   :  { %2993 = vpow2.f32 %v682_v49  ;;  %v667_v3 = vsub.f32 %v3523_v25, %v627_v63  ;;  %v668_v55 = vsub.f32 %v3535_v31, %v630_v62 }
 0x1f1   :  { %2995 = vpow2.f32 %v684_v6 }
 0x1f2   :  { %v686_v54 = vmul.f32 1.442695, %v667_v3  ;;  %v688_v56 = vmul.f32 1.442695, %v668_v55 }
 0x1f3   :  { %v633_v20 = vpop.xlane.xlu1 %632  ;;  %v636_v59 = vpop.xlane.xlu0 %635 }
 0x1f4   :  { %2997 = vpow2.f32 %v686_v54  ;;  %v669_v10 = vsub.f32 %v3531_v29, %v633_v20  ;;  %v670_v0 = vsub.f32 %v3543_v35, %v636_v59 }
 0x1f5   :  { %2999 = vpow2.f32 %v688_v56 }
 0x1f6   :  { %v2992_v2 = vpop.eup %2991  ;;  %v690_v7 = vmul.f32 1.442695, %v669_v10  ;;  %v692_v18 = vmul.f32 1.442695, %v670_v0 }
 0x1f7   :  { %2434 = vmatprep.mubr.msk.f32.mxu1 %vm615_vm1, %v2992_v2  ;;  %v639_v49 = vpop.xlane.xlu1 %638  ;;  %v642_v63 = vpop.xlane.xlu0 %641  ;;  %v712_v62 = vsel %vm615_vm1, %v2992_v2, 0.0 }
 0x1f8   :  { %3001 = vpow2.f32 %v690_v7  ;;  %v671_v55 = vsub.f32 %v3539_v33, %v639_v49  ;;  %v672_v6 = vsub.f32 %v3551_v39, %v642_v63  ;;  %713 = vadd.xlane.f32.xlu0 %v712_v62 }
 0x1f9   :  { %3003 = vpow2.f32 %v692_v18 }
 0x1fa   :  { %v2994_v54 = vpop.eup %2993  ;;  %v694_v3 = vmul.f32 1.442695, %v671_v55  ;;  %v696_v59 = vmul.f32 1.442695, %v672_v6 }
 0x1fb   :  { %v2996_v56 = vpop.eup %2995  ;;  %v645_v20 = vpop.xlane.xlu1 %644  ;;  %2435 = vmatmul.mubr.msk.f32.vlgmr.msra.gmra.mrb[0].mxu1 %vm615_vm1, %v2994_v54  ;;  %v715_v0 = vsel %vm615_vm1, %v2994_v54, 0.0 }
 0x1fc   :  { %v648_v10 = vpop.xlane.xlu0 %647  ;;  %3005 = vpow2.f32 %v694_v3  ;;  %v673_v2 = vsub.f32 %v3547_v37, %v645_v20  ;;  %2757 = vmatpush3.bf16.msra.mxu1 %v3445_v57  ;;  %716 = vadd.xlane.f32.xlu1 %v715_v0  ;;  %v718_v18 = vsel %vm615_vm1, %v2996_v56, 0.0 }
 0x1fd   :  { %v674_v7 = vsub.f32 %v3563_v44, %v648_v10  ;;  %3007 = vpow2.f32 %v696_v59  ;;  %719 = vadd.xlane.f32.xlu0 %v718_v18  ;;  %2437 = vmatprep.mubr.msk.f32.mxu1 %vm615_vm1, %v2996_v56 }
 0x1fe   :  { %v2998_v49 = vpop.eup %2997  ;;  %v698_v63 = vmul.f32 1.442695, %v673_v2  ;;  %2759 = vmatprep.subr.bf16.mxu1 %v3455_v61 }
 0x1ff   :  { %v700_v62 = vmul.f32 1.442695, %v674_v7  ;;  %v3000_v55 = vpop.eup %2999  ;;  %v651_v6 = vpop.xlane.xlu1 %650  ;;  %2438 = vmatmul.mubr.msk.f32.gmra.mrb[2].mxu1 %vm615_vm1, %v2998_v49  ;;  %v721_v3 = vsel %vm615_vm1, %v2998_v49, 0.0 }
 0x200   :  { %v654_v54 = vpop.xlane.xlu0 %653  ;;  %3009 = vpow2.f32 %v698_v63  ;;  %v675_v57 = vsub.f32 %v3559_v42, %v651_v6  ;;  %2761 = vmatpush3.bf16.msra.mxu1 %v3455_v61  ;;  %722 = vadd.xlane.f32.xlu1 %v721_v3  ;;  %v724_v56 = vsel %vm615_vm1, %v3000_v55, 0.0 }
 0x201   :  { %v676_v59 = vsub.f32 %v3579_v50, %v654_v54  ;;  %3011 = vpow2.f32 %v700_v62  ;;  %725 = vadd.xlane.f32.xlu0 %v724_v56  ;;  %2440 = vmatprep.mubr.msk.f32.mxu1 %vm615_vm1, %v3000_v55 }
 0x202   :  { %v3002_v20 = vpop.eup %3001  ;;  %v702_v10 = vmul.f32 1.442695, %v675_v57  ;;  %2763 = vmatprep.subr.bf16.mxu1 %v3465_v1 }
 0x203   :  { %v704_v0 = vmul.f32 1.442695, %v676_v59  ;;  %v3004_v2 = vpop.eup %3003  ;;  %v657_v7 = vpop.xlane.xlu1 %656  ;;  %2441 = vmatmul.mubr.msk.f32.gmra.mrb[4].mxu1 %vm615_vm1, %v3002_v20  ;;  %v727_v49 = vsel %vm615_vm1, %v3002_v20, 0.0 }
 0x204   :  { %v660_v18 = vpop.xlane.xlu0 %659  ;;  %3013 = vpow2.f32 %v702_v10  ;;  %v677_v61 = vsub.f32 %v3575_v48, %v657_v7  ;;  %2765 = vmatpush3.bf16.msra.mxu1 %v3465_v1  ;;  %728 = vadd.xlane.f32.xlu1 %v727_v49  ;;  %v730_v62 = vsel %vm615_vm1, %v3004_v2, 0.0 }
 0x205   :  { %v678_v63 = vsub.f32 %v3595_v28, %v660_v18  ;;  %3015 = vpow2.f32 %v704_v0  ;;  %731 = vadd.xlane.f32.xlu0 %v730_v62  ;;  %2443 = vmatprep.mubr.msk.f32.mxu1 %vm615_vm1, %v3004_v2 }
 0x206   :  { %v3006_v55 = vpop.eup %3005  ;;  %v706_v6 = vmul.f32 1.442695, %v677_v61  ;;  %2767 = vmatprep.subr.bf16.mxu1 %v3475_v5 }
 0x207   :  { %v708_v54 = vmul.f32 1.442695, %v678_v63  ;;  %v3008_v3 = vpop.eup %3007  ;;  %v663_v57 = vpop.xlane.xlu1 %662  ;;  %2444 = vmatmul.mubr.msk.f32.gmra.mrb[6].mxu1 %vm615_vm1, %v3006_v55  ;;  %v733_v59 = vsel %vm615_vm1, %v3006_v55, 0.0 }
 0x208   :  { %3017 = vpow2.f32 %v706_v6  ;;  %v679_v1 = vsub.f32 %v3591_v24, %v663_v57  ;;  %2769 = vmatpush3.bf16.msra.mxu1 %v3475_v5  ;;  %734 = vadd.xlane.f32.xlu1 %v733_v59  ;;  %v736_v56 = vsel %vm615_vm1, %v3008_v3, 0.0  ;;  %v1249_v57 = vsel %vm1239_vm2, %v3523_v25, -inf }
 0x209   :  { %3019 = vpow2.f32 %v708_v54  ;;  %737 = vadd.xlane.f32.xlu0 %v736_v56  ;;  %2446 = vmatprep.mubr.msk.f32.mxu1 %vm615_vm1, %v3008_v3  ;;  %v1240_v54 = vsel %vm1239_vm2, %v3519_v23, -inf  ;;  %v1246_v3 = vsel %vm1239_vm2, %v3525_v26, -inf  ;;  %v1255_v59 = vsel %vm1239_vm2, %v3531_v29, -inf }
 0x20a   :  { %v3010_v20 = vpop.eup %3009  ;;  %v710_v10 = vmul.f32 1.442695, %v679_v1  ;;  %2771 = vmatprep.subr.bf16.mxu1 %v3485_v9  ;;  %v1258_v1 = vsel %vm1239_vm2, %v3543_v35, -inf  ;;  %v1261_v56 = vsel %vm1239_vm2, %v3539_v33, -inf }
 0x20b   :  { %v3012_v0 = vpop.eup %3011  ;;  %2447 = vmatmul.mubr.msk.f32.gmra.mrb[8].mxu1 %vm615_vm1, %v3010_v20  ;;  %v739_v2 = vsel %vm615_vm1, %v3010_v20, 0.0  ;;  %v4305_v20 = vpack.i.bf16 %v3607_v36, %v3611_v41  ;;  %v4307_v36 = vpack.i.bf16 %v3637_v38, %v3639_v12  ;;  %v4308_v41 = vpack.i.bf16 %v3645_v4, %v3649_v8 }
 0x20c   :  { %3021 = vpow2.f32 %v710_v10  ;;  %2773 = vmatpush3.bf16.msra.mxu1 %v3485_v9  ;;  %740 = vadd.xlane.f32.xlu1 %v739_v2  ;;  %v742_v5 = vsel %vm615_vm1, %v3012_v0, 0.0  ;;  %v4306_v10 = vpack.i.bf16 %v3625_v52, %v3629_v27 }
 0x20d   :  { %743 = vadd.xlane.f32.xlu0 %v742_v5  ;;  %2449 = vmatprep.mubr.msk.f32.mxu1 %vm615_vm1, %v3012_v0  ;;  %v1264_v0 = vsel %vm1239_vm2, %v3551_v39, -inf }
 0x20e   :  { %v3014_v7 = vpop.eup %3013  ;;  %2775 = vmatprep.subr.bf16.mxu1 %v3495_v13 }
 0x20f   :  { %v3016_v18 = vpop.eup %3015  ;;  %2450 = vmatmul.mubr.msk.f32.gmra.mrb[10].mxu1 %vm615_vm1, %v3014_v7  ;;  %v745_v49 = vsel %vm615_vm1, %v3014_v7, 0.0 }
 0x210   :  { %2777 = vmatpush3.bf16.msra.mxu1 %v3495_v13  ;;  %746 = vadd.xlane.f32.xlu1 %v745_v49  ;;  %v748_v61 = vsel %vm615_vm1, %v3016_v18, 0.0  ;;  %v4309_v49 = vpack.i.bf16 %v3657_v60, %v3659_v16  ;;  %v4311_v16 = vpack.i.bf16 %v3685_v15, %v3689_v14 }
 0x211   :  { %749 = vadd.xlane.f32.xlu0 %v748_v61  ;;  %2452 = vmatprep.mubr.msk.f32.mxu1 %vm615_vm1, %v3016_v18 }
 0x212   :  { %v3018_v9 = vpop.eup %3017  ;;  %2779 = vmatprep.subr.bf16.mxu1 %v3505_v17 }
 0x213   :  { %v3020_v63 = vpop.eup %3019  ;;  %2453 = vmatmul.mubr.msk.f32.gmra.mrb[12].mxu1 %vm615_vm1, %v3018_v9  ;;  %v751_v62 = vsel %vm615_vm1, %v3018_v9, 0.0 }
 0x214   :  { %2781 = vmatpush3.bf16.msra.mxu1 %v3505_v17  ;;  %752 = vadd.xlane.f32.xlu1 %v751_v62  ;;  %v754_v55 = vsel %vm615_vm1, %v3020_v63, 0.0  ;;  %v1243_v17 = vsel %vm1239_vm2, %v3517_v22, -inf }
 0x215   :  { %755 = vadd.xlane.f32.xlu0 %v754_v55  ;;  %2455 = vmatprep.mubr.msk.f32.mxu1 %vm615_vm1, %v3020_v63  ;;  %v4310_v63 = vpack.i.bf16 %v3665_v46, %v3669_v19 }
 0x216   :  { %v3022_v13 = vpop.eup %3021  ;;  %2783 = vmatprep.subr.bf16.mxu1 %v3515_v21 }
 0x217   :  { %2456 = vmatmul.mubr.msk.f32.gmra.mrb[14].mxu1 %vm615_vm1, %v3022_v13  ;;  %v757_v6 = vsel %vm615_vm1, %v3022_v13, 0.0 }
 0x218   :  { %2785 = vmatpush3.bf16.msra.mxu1 %v3515_v21  ;;  %758 = vadd.xlane.f32.xlu1 %v757_v6  ;;  %v1252_v21 = vsel %vm1239_vm2, %v3535_v31, -inf }
 0x219   :  { %1241 = vmax.xlane.f32.xlu0 %v1240_v54 }
 0x21c   :  { %1244 = vmax.xlane.f32.xlu1 %v1243_v17 }
 0x21d   :  { %1247 = vmax.xlane.f32.xlu0 %v1246_v3 }
 0x220   :  { %1250 = vmax.xlane.f32.xlu1 %v1249_v57 }
 0x221   :  { %1253 = vmax.xlane.f32.xlu0 %v1252_v21 }
 0x224   :  { %1256 = vmax.xlane.f32.xlu1 %v1255_v59 }
 0x228   :  { %1259 = vmax.xlane.f32.xlu1 %v1258_v1 }
 0x22c   :  { %1262 = vmax.xlane.f32.xlu1 %v1261_v56 }
 0x237   :  { %2910 = vrot.lane.b32.xlu0 %v4305_v20, %s3266_s4 }
 0x23d   :  { %2915 = vrot.lane.b32.xlu1 %v4306_v10, %s3266_s4 }
 0x256   :  { %1265 = vmax.xlane.f32.xlu0 %v1264_v0 }
 0x261   :  { %1268 = vmax.xlane.f32.xlu1 %v3555_v40 }
 0x265   :  { %1271 = vmax.xlane.f32.xlu1 %v3573_v47  ;;  %v3823_v47 = vld [vmem:[#allocation7] sm:$0xff] }
 0x266   :  { %2490 = vmatprep.mubr.f32.mxu0 %v3823_v47 }
 0x269   :  { %1274 = vmax.xlane.f32.xlu1 %v3567_v45 }
 0x26c   :  { %2920 = vrot.lane.b32.xlu0 %v4307_v36, %s3266_s4 }
 0x27a   :  { %2925 = vrot.lane.b32.xlu1 %v4308_v41, %s3266_s4 }
 0x285   :  { %v3812_v52 = vpop.xlane.xlu0 %713 }
 0x289   :  { %v3814_v27 = vpop.xlane.xlu1 %716 }
 0x28a   :  { %v3816_v2 = vpop.xlane.xlu0 %719 }
 0x28b   :  { %1277 = vmax.xlane.f32.xlu0 %v3589_v53 }
 0x28d   :  { %v3819_v40 = vpop.xlane.xlu1 %722 }
 0x28e   :  { %v3821_v45 = vpop.xlane.xlu0 %725 }
 0x291   :  { %v3826_v12 = vpop.xlane.xlu1 %728 }
 0x292   :  { %v3828_v4 = vpop.xlane.xlu0 %731 }
 0x295   :  { %v3830_v8 = vpop.xlane.xlu1 %734 }
 0x296   :  { %v3832_v38 = vpop.xlane.xlu0 %737 }
 0x299   :  { %v3834_v5 = vpop.xlane.xlu1 %740 }
 0x29a   :  { %v3836_v7 = vpop.xlane.xlu0 %743 }
 0x29d   :  { %v3838_v53 = vpop.xlane.xlu1 %746 }
 0x29e   :  { %v3840_v18 = vpop.xlane.xlu0 %749  ;;  %1280 = vmax.xlane.f32.xlu1 %v3583_v51 }
 0x2a1   :  { %2930 = vrot.lane.b32.xlu0 %v4309_v49, %s3266_s4  ;;  %v3847_v61 = vpop.xlane.xlu1 %752 }
 0x2a2   :  { %v3849_v9 = vpop.xlane.xlu0 %755  ;;  %1283 = vmax.xlane.f32.xlu1 %v3605_v34 }
 0x2a5   :  { %2935 = vrot.lane.b32.xlu0 %v4310_v63, %s3266_s4  ;;  %v3856_v62 = vpop.xlane.xlu1 %758 }
 0x2a6   :  { %v1242_v55 = vpop.xlane.xlu0 %1241  ;;  %1286 = vmax.xlane.f32.xlu1 %v3599_v30 }
 0x2a7   :  { %v1288_v51 = vsub.f32 %v3519_v23, %v1242_v55 }
 0x2a9   :  { %v1304_v60 = vmul.f32 1.442695, %v1288_v51  ;;  %2945 = vrot.lane.b32.xlu0 %v4311_v16, %s3266_s4  ;;  %v1245_v13 = vpop.xlane.xlu1 %1244 }
 0x2aa   :  { %v1289_v34 = vsub.f32 %v3517_v22, %v1245_v13  ;;  %v1248_v6 = vpop.xlane.xlu0 %1247 }
 0x2ab   :  { %3023 = vpow2.f32 %v1304_v60  ;;  %v1290_v19 = vsub.f32 %v3525_v26, %v1248_v6  ;;  %v3894_v60 = vld [vmem:[#allocation10] sm:$0xff]  ;;  %v3900_v6 = vld [vmem:[#allocation10 + $0x18] sm:$0xff] }
 0x2ac   :  { %v1306_v46 = vmul.f32 1.442695, %v1289_v34 }
 0x2ad   :  { %v1251_v54 = vpop.xlane.xlu1 %1250  ;;  %v1308_v23 = vmul.f32 1.442695, %v1290_v19 }
 0x2ae   :  { %3025 = vpow2.f32 %v1306_v46  ;;  %v1291_v30 = vsub.f32 %v3523_v25, %v1251_v54  ;;  %v1254_v17 = vpop.xlane.xlu0 %1253 }
 0x2af   :  { %v1292_v3 = vsub.f32 %v3535_v31, %v1254_v17 }
 0x2b0   :  { %v1310_v57 = vmul.f32 1.442695, %v1291_v30 }
 0x2b1   :  { %v1257_v21 = vpop.xlane.xlu1 %1256  ;;  %v1312_v22 = vmul.f32 1.442695, %v1292_v3 }
 0x2b2   :  { %3027 = vpow2.f32 %v1310_v57  ;;  %v1293_v14 = vsub.f32 %v3531_v29, %v1257_v21  ;;  %v2911_v15 = vpop.permute.xlu0 %2910  ;;  %v4312_v29 = vpack.i.bf16 %v3677_v32, %v3679_v11  ;;  %v3892_v32 = vld [vmem:[#allocation10 + $0x8] sm:$0xff] }
 0x2b3   :  { %3029 = vpow2.f32 %v1308_v23  ;;  %v2913_v59 = vunpack.i.h.bf16 %v2911_v15  ;;  %v2912_v1 = vunpack.i.l.bf16 %v2911_v15  ;;  %v3908_v23 = vld [vmem:[#allocation10 + $0x28] sm:$0xff] }
 0x2b4   :  { %v1314_v26 = vmul.f32 1.442695, %v1293_v14  ;;  %v3910_v14 = vld [vmem:[#allocation10 + $0x20] sm:$0xff] }
 0x2b5   :  { %v3024_v56 = vpop.eup %3023  ;;  %v3869_v20 = vpack.c.bf16 %v2913_v59, %v2912_v1  ;;  %v1260_v10 = vpop.xlane.xlu1 %1259 }
 0x2b6   :  { %3031 = vpow2.f32 %v1314_v26  ;;  %v1294_v25 = vsub.f32 %v3543_v35, %v1260_v10  ;;  %1352 = vrot.lane.b32.xlu0 %v3024_v56, %s3266_s4  ;;  %v3916_v26 = vld [vmem:[#allocation10 + $0x38] sm:$0xff] }
 0x2b7   :  { %3033 = vpow2.f32 %v1312_v22  ;;  %2788 = vmatprep.subr.msk.bf16.mxu1 %vm3615_vm3, %v3869_v20  ;;  %2940 = vrot.lane.b32.xlu1 %v4312_v29, %s3266_s4  ;;  %v3918_v29 = vld [vmem:[#allocation10 + $0x30] sm:$0xff] }
 0x2b8   :  { %v3026_v31 = vpop.eup %3025  ;;  %v1316_v0 = vmul.f32 1.442695, %v1294_v25 }
 0x2b9   :  { %v1263_v36 = vpop.xlane.xlu1 %1262 }
 0x2ba   :  { %3035 = vpow2.f32 %v1316_v0  ;;  %v1295_v41 = vsub.f32 %v3539_v33, %v1263_v36  ;;  %1354 = vrot.lane.b32.xlu0 %v3026_v31, %s3266_s4 }
 0x2bc   :  { %v3028_v35 = vpop.eup %3027  ;;  %v1318_v49 = vmul.f32 1.442695, %v1295_v41 }
 0x2bd   :  { %v3030_v63 = vpop.eup %3029  ;;  %1358 = vrot.lane.b32.xlu1 %v3028_v35, %s3266_s4  ;;  %v3924_v35 = vld [vmem:[#allocation10 + $0x48] sm:$0xff] }
 0x2be   :  { %3037 = vpow2.f32 %v1318_v49  ;;  %1356 = vrot.lane.b32.xlu0 %v3030_v63, %s3266_s4 }
 0x2bf   :  { %3039 = vrcp.f32 %v3814_v27 }
 0x2c0   :  { %v3032_v55 = vpop.eup %3031  ;;  %3041 = vrcp.f32 %v3812_v52 }
 0x2c1   :  { %v3034_v51 = vpop.eup %3033  ;;  %1362 = vrot.lane.b32.xlu1 %v3032_v55, %s3266_s4  ;;  %3043 = vrcp.f32 %v3819_v40 }
 0x2c2   :  { %1360 = vrot.lane.b32.xlu0 %v3034_v51, %s3266_s4  ;;  %3045 = vrcp.f32 %v3816_v2  ;;  %v3902_v2 = vld [vmem:[#allocation10 + $0x10] sm:$0xff]  ;;  %v3926_v51 = vld [vmem:[#allocation10 + $0x40] sm:$0xff] }
 0x2c3   :  { %3047 = vrcp.f32 %v3826_v12 }
 0x2c4   :  { %v3036_v11 = vpop.eup %3035  ;;  %3049 = vrcp.f32 %v3821_v45 }
 0x2c5   :  { %3051 = vrcp.f32 %v3830_v8 }
 0x2c6   :  { %1364 = vrot.lane.b32.xlu0 %v3036_v11, %s3266_s4  ;;  %3053 = vrcp.f32 %v3828_v4 }
 0x2c7   :  { %3055 = vrcp.f32 %v3834_v5 }
 0x2c8   :  { %v3038_v33 = vpop.eup %3037  ;;  %3057 = vrcp.f32 %v3832_v38 }
 0x2c9   :  { %1366 = vrot.lane.b32.xlu1 %v3038_v33, %s3266_s4  ;;  %v3040_v52 = vpop.eup %3039  ;;  %3059 = vrcp.f32 %v3838_v53 }
 0x2ca   :  { %v3042_v40 = vpop.eup %3041  ;;  %3061 = vrcp.f32 %v3836_v7 }
 0x2cb   :  { %v3044_v30 = vpop.eup %3043  ;;  %3063 = vrcp.f32 %v3847_v61 }
 0x2cc   :  { %v3046_v57 = vpop.eup %3045  ;;  %3065 = vrcp.f32 %v3840_v18 }
 0x2cd   :  { %v3048_v59 = vpop.eup %3047  ;;  %3067 = vrcp.f32 %v3856_v62 }
 0x2ce   :  { %v2436_v16 = vpop.f32.mrb[0].mxu1  ;;  %v3050_v10 = vpop.eup %3049  ;;  %3069 = vrcp.f32 %v3849_v9 }
 0x2cf   :  { %v1018_v27 = vmul.f32 %v2436_v16, %v3892_v32  ;;  %v938_v13 = vpop.f32.mrb[1].mxu1  ;;  %v3052_v36 = vpop.eup %3051 }
 0x2d0   :  { %v1017_v34 = vmul.f32 %v938_v13, %v3894_v60  ;;  %v3054_v63 = vpop.eup %3053  ;;  %v3932_v13 = vld [vmem:[#allocation10 + $0x58] sm:$0xff] }
 0x2d1   :  { %v1034_v19 = vmul.f32 %v3040_v52, %v1018_v27  ;;  %v3056_v16 = vpop.eup %3055 }
 0x2d2   :  { %v1033_v46 = vmul.f32 %v3042_v40, %v1017_v34  ;;  %v2439_v54 = vpop.f32.mrb[2].mxu1  ;;  %v3058_v34 = vpop.eup %3057 }
 0x2d3   :  { %v1020_v45 = vmul.f32 %v2439_v54, %v3900_v6  ;;  %v948_v12 = vpop.f32.mrb[3].mxu1 }
 0x2d4   :  { %v1019_v17 = vmul.f32 %v948_v12, %v3902_v2  ;;  %v2722_v3 = vpack.c.bf16 %v1034_v19, %v1033_v46  ;;  %v3934_v19 = vld [vmem:[#allocation10 + $0x50] sm:$0xff]  ;;  %v3060_v12 = vpop.eup %3059 }
 0x2d5   :  { %v1036_v21 = vmul.f32 %v3044_v30, %v1020_v45 }
 0x2d6   :  { %v1035_v8 = vmul.f32 %v3046_v57, %v1019_v17  ;;  %v2442_v15 = vpop.f32.mrb[4].mxu1  ;;  %2723 = vmatprep.subr.bf16.mxu0 %v2722_v3 }
 0x2d7   :  { %v1022_v4 = vmul.f32 %v2442_v15, %v3908_v23  ;;  %v958_v22 = vpop.f32.mrb[5].mxu1  ;;  %2725 = vmatpush3.bf16.xpose.msra.mxu0 %v2722_v3  ;;  %v3941_v3 = vld [vmem:[#allocation10 + $0x68] sm:$0xff]  ;;  %v3943_v15 = vld [vmem:[#allocation10 + $0x60] sm:$0xff] }
 0x2d8   :  { %v1021_v1 = vmul.f32 %v958_v22, %v3910_v14  ;;  %v2726_v56 = vpack.c.bf16 %v1036_v21, %v1035_v8  ;;  %v3062_v21 = vpop.eup %3061 }
 0x2d9   :  { %v1038_v25 = vmul.f32 %v3048_v59, %v1022_v4 }
 0x2da   :  { %v1037_v5 = vmul.f32 %v3050_v10, %v1021_v1  ;;  %v2445_v31 = vpop.f32.mrb[6].mxu1  ;;  %2727 = vmatprep.subr.bf16.mxu0 %v2726_v56  ;;  %v3064_v1 = vpop.eup %3063 }
 0x2db   :  { %v1024_v38 = vmul.f32 %v2445_v31, %v3916_v26  ;;  %v968_v0 = vpop.f32.mrb[7].mxu1  ;;  %v3066_v10 = vpop.eup %3065 }
 0x2dc   :  { %v1023_v41 = vmul.f32 %v968_v0, %v3918_v29  ;;  %v2730_v49 = vpack.c.bf16 %v1038_v25, %v1037_v5  ;;  %v3949_v5 = vld [vmem:[#allocation10 + $0x70] sm:$0xff] }
 0x2dd   :  { %v1040_v55 = vmul.f32 %v3052_v36, %v1024_v38  ;;  %v3951_v38 = vpop.permute.xlu1 %2915 }
 0x2de   :  { %v1039_v53 = vmul.f32 %v3054_v63, %v1023_v41  ;;  %v2448_v11 = vpop.f32.mrb[8].mxu1 }
 0x2df   :  { %v1026_v7 = vmul.f32 %v2448_v11, %v3924_v35  ;;  %v978_v33 = vpop.f32.mrb[9].mxu1  ;;  %2729 = vmatpush3.bf16.xpose.msra.mxu0 %v2726_v56  ;;  %v3947_v56 = vld [vmem:[#allocation10 + $0x78] sm:$0xff] }
 0x2e0   :  { %v1025_v27 = vmul.f32 %v978_v33, %v3926_v51  ;;  %2731 = vmatprep.subr.bf16.mxu0 %v2730_v49  ;;  %v2734_v52 = vpack.c.bf16 %v1040_v55, %v1039_v53 }
 0x2e1   :  { %v1042_v40 = vmul.f32 %v3056_v16, %v1026_v7 }
 0x2e2   :  { %v1041_v61 = vmul.f32 %v3058_v34, %v1025_v27  ;;  %v2451_v46 = vpop.f32.mrb[10].mxu1 }
 0x2e3   :  { %v1266_v18 = vpop.xlane.xlu0 %1265  ;;  %v1028_v54 = vmul.f32 %v2451_v46, %v3932_v13  ;;  %v988_v45 = vpop.f32.mrb[11].mxu1 }
 0x2e4   :  { %v1296_v30 = vsub.f32 %v3551_v39, %v1266_v18  ;;  %v1027_v17 = vmul.f32 %v988_v45, %v3934_v19  ;;  %v2738_v57 = vpack.c.bf16 %v1042_v40, %v1041_v61 }
 0x2e5   :  { %v1044_v8 = vmul.f32 %v3060_v12, %v1028_v54 }
 0x2e6   :  { %v1320_v62 = vmul.f32 1.442695, %v1296_v30  ;;  %v1043_v4 = vmul.f32 %v3062_v21, %v1027_v17  ;;  %v2454_v22 = vpop.f32.mrb[12].mxu1  ;;  %v3962_v17 = vld [vmem:[#allocation7 + $0x8] sm:$0xff]  ;;  %v3970_v21 = vld [vmem:[#allocation7 + $0x18] sm:$0xff] }
 0x2e7   :  { %v1030_v9 = vmul.f32 %v2454_v22, %v3941_v3  ;;  %v998_v59 = vpop.f32.mrb[13].mxu1  ;;  %2733 = vmatpush3.bf16.xpose.msra.mxu0 %v2730_v49  ;;  %v3068_v49 = vpop.eup %3067 }
 0x2e8   :  { %3071 = vpow2.f32 %v1320_v62  ;;  %v1029_v39 = vmul.f32 %v998_v59, %v3943_v15  ;;  %2735 = vmatprep.subr.bf16.mxu0 %v2734_v52  ;;  %v2742_v31 = vpack.c.bf16 %v1044_v8, %v1043_v4  ;;  %v3070_v11 = vpop.eup %3069 }
 0x2e9   :  { %v1046_v25 = vmul.f32 %v3064_v1, %v1030_v9 }
 0x2ea   :  { %v1045_v0 = vmul.f32 %v3066_v10, %v1029_v39  ;;  %v2457_v36 = vpop.f32.mrb[14].mxu1 }
 0x2eb   :  { %v1032_v41 = vmul.f32 %v2457_v36, %v3947_v56  ;;  %v1008_v63 = vpop.f32.mrb[15].mxu1 }
 0x2ec   :  { %v1031_v55 = vmul.f32 %v1008_v63, %v3949_v5  ;;  %v2746_v53 = vpack.c.bf16 %v1046_v25, %v1045_v0 }
 0x2ed   :  { %v1048_v7 = vmul.f32 %v3068_v49, %v1032_v41 }
 0x2ee   :  { %v1047_v33 = vmul.f32 %v3070_v11, %v1031_v55  ;;  %v1269_v16 = vpop.xlane.xlu1 %1268 }
 0x2ef   :  { %v1297_v27 = vsub.f32 %v3547_v37, %v1269_v16  ;;  %2737 = vmatpush3.bf16.xpose.msra.mxu0 %v2734_v52 }
 0x2f0   :  { %2739 = vmatprep.subr.bf16.mxu0 %v2738_v57  ;;  %v2750_v34 = vpack.c.bf16 %v1048_v7, %v1047_v33 }
 0x2f1   :  { %v1322_v40 = vmul.f32 1.442695, %v1297_v27 }
 0x2f2   :  { %v3072_v61 = vpop.eup %3071  ;;  %v1272_v46 = vpop.xlane.xlu1 %1271 }
 0x2f3   :  { %3073 = vpow2.f32 %v1322_v40  ;;  %v1298_v18 = vsub.f32 %v3563_v44, %v1272_v46  ;;  %1368 = vrot.lane.b32.xlu0 %v3072_v61, %s3266_s4 }
 0x2f5   :  { %v1324_v54 = vmul.f32 1.442695, %v1298_v18 }
 0x2f6   :  { %v1275_v45 = vpop.xlane.xlu1 %1274 }
 0x2f7   :  { %3075 = vpow2.f32 %v1324_v54  ;;  %v1299_v12 = vsub.f32 %v3559_v42, %v1275_v45  ;;  %2741 = vmatpush3.bf16.xpose.msra.mxu0 %v2738_v57  ;;  %v3964_v42 = vpop.permute.xlu0 %2920  ;;  %v3966_v57 = vld [vmem:[#allocation7 + $0x10] sm:$0xff] }
 0x2f8   :  { %2743 = vmatprep.subr.bf16.mxu0 %v2742_v31 }
 0x2f9   :  { %v1326_v30 = vmul.f32 1.442695, %v1299_v12 }
 0x2fa   :  { %v3975_v9 = vpop.permute.xlu1 %2925 }
 0x2fb   :  { %3077 = vpow2.f32 %v1326_v30 }
 0x2fd   :  { %v3074_v37 = vpop.eup %3073 }
 0x2fe   :  { %1370 = vrot.lane.b32.xlu1 %v3074_v37, %s3266_s4 }
 0x2ff   :  { %2745 = vmatpush3.bf16.xpose.msra.mxu0 %v2742_v31 }
 0x300   :  { %2747 = vmatprep.subr.bf16.mxu0 %v2746_v53 }
 0x301   :  { %v3076_v52 = vpop.eup %3075 }
 0x302   :  { %1372 = vrot.lane.b32.xlu0 %v3076_v52, %s3266_s4 }
 0x305   :  { %v3078_v44 = vpop.eup %3077 }
 0x306   :  { %1374 = vrot.lane.b32.xlu1 %v3078_v44, %s3266_s4 }
 0x307   :  { %2749 = vmatpush3.bf16.xpose.msra.mxu0 %v2746_v53 }
 0x308   :  { %2751 = vmatprep.subr.bf16.mxu0 %v2750_v34 }
 0x30f   :  { %2753 = vmatpush3.bf16.xpose.msra.mxu0 %v2750_v34 }
 0x316   :  { %2491 = vmatmul.mubr.f32.vlgmr.msra.gmra.mrb[48].mxu0 %v3962_v17 }
 0x317   :  { %2493 = vmatprep.mubr.f32.mxu0 %v3966_v57 }
 0x318   :  { %v1278_v8 = vpop.xlane.xlu0 %1277 }
 0x319   :  { %v1300_v62 = vsub.f32 %v3579_v50, %v1278_v8 }
 0x31a   :  { %2494 = vmatmul.mubr.f32.gmra.mrb[50].mxu0 %v3970_v21 }
 0x31b   :  { %v1328_v4 = vmul.f32 1.442695, %v1300_v62  ;;  %2622 = vmatprep.mubr.f32.mxu0 %v3823_v47 }
 0x31c   :  { %v3983_v63 = vpop.permute.xlu0 %2930 }
 0x31d   :  { %3079 = vpow2.f32 %v1328_v4 }
 0x320   :  { %v3986_v49 = vpop.permute.xlu0 %2935 }
 0x327   :  { %v3080_v22 = vpop.eup %3079 }
 0x328   :  { %1376 = vrot.lane.b32.xlu0 %v3080_v22, %s3266_s4 }
 0x32b   :  { %v1281_v59 = vpop.xlane.xlu1 %1280 }
 0x32c   :  { %v1301_v1 = vsub.f32 %v3575_v48, %v1281_v59 }
 0x32e   :  { %v1330_v39 = vmul.f32 1.442695, %v1301_v1 }
 0x32f   :  { %v1284_v10 = vpop.xlane.xlu1 %1283 }
 0x330   :  { %3081 = vpow2.f32 %v1330_v39  ;;  %v1302_v25 = vsub.f32 %v3595_v28, %v1284_v10  ;;  %v3988_v28 = vpop.permute.xlu0 %2945 }
 0x332   :  { %v1332_v50 = vmul.f32 1.442695, %v1302_v25 }
 0x333   :  { %v1287_v31 = vpop.xlane.xlu1 %1286 }
 0x334   :  { %3083 = vpow2.f32 %v1332_v50  ;;  %v1303_v0 = vsub.f32 %v3591_v24, %v1287_v31  ;;  %v3990_v55 = vpop.permute.xlu0 %1352 }
 0x335   :  { %v1400_v11 = vsel %vm615_vm1, %v3990_v55, 0.0 }
 0x336   :  { %v1334_v47 = vmul.f32 1.442695, %v1303_v0 }
 0x337   :  { %v3994_v53 = vpop.permute.xlu1 %2940 }
 0x338   :  { %3085 = vpow2.f32 %v1334_v47  ;;  %v3992_v24 = vpop.permute.xlu0 %1354 }
 0x339   :  { %v1403_v61 = vsel %vm615_vm1, %v3992_v24, 0.0 }
 0x33a   :  { %v3082_v36 = vpop.eup %3081 }
 0x33b   :  { %1378 = vrot.lane.b32.xlu1 %v3082_v36, %s3266_s4  ;;  %v4000_v33 = vpop.permute.xlu1 %1358  ;;  %v3267_v36 = vmov 0  }
 0x33c   :  { %v3998_v7 = vpop.permute.xlu0 %1356  ;;  %v1409_v40 = vsel %vm615_vm1, %v4000_v33, 0.0  ;;  %2990 = vset.pattern.permute.xlu1 %v3267_v36  ;;  %2989 = vset.pattern.permute.xlu0 %v3267_v36  ;;  %v4331_v36 = vld [vmem:[#allocation26_spill] sm:$0xff] }
 0x33d   :  { %v1406_v16 = vsel %vm615_vm1, %v3998_v7, 0.0 }
 0x33e   :  { %v3084_v41 = vpop.eup %3083 }
 0x33f   :  { %1380 = vrot.lane.b32.xlu0 %v3084_v41, %s3266_s4  ;;  %v4006_v34 = vpop.permute.xlu1 %1362  ;;  %v4313_v41 = vld [vmem:[#allocation18_spill] sm:$0xff] }
 0x340   :  { %v4004_v27 = vpop.permute.xlu0 %1360  ;;  %v1415_v54 = vsel %vm615_vm1, %v4006_v34, 0.0 }
 0x341   :  { %v1412_v46 = vsel %vm615_vm1, %v4004_v27, 0.0 }
 0x342   :  { %v3086_v48 = vpop.eup %3085 }
 0x343   :  { %1382 = vrot.lane.b32.xlu1 %v3086_v48, %s3266_s4  ;;  %v4018_v45 = vpop.permute.xlu1 %1366  ;;  %v4314_v48 = vpack.i.bf16 %v3447_v58, %v4313_v41 }
 0x344   :  { %v4014_v18 = vpop.permute.xlu0 %1364  ;;  %v1421_v37 = vsel %vm615_vm1, %v4018_v45, 0.0 }
 0x345   :  { %v1418_v12 = vsel %vm615_vm1, %v4014_v18, 0.0 }
 0x35e   :  { %1401 = vadd.xlane.f32.xlu0 %v1400_v11  ;;  %v4315_v11 = vld [vmem:[#allocation16_spill] sm:$0xff] }
 0x362   :  { %1407 = vadd.xlane.f32.xlu0 %v1406_v16  ;;  %v4316_v16 = vld [vmem:[#allocation17_spill] sm:$0xff] }
 0x365   :  { %v4022_v30 = vpop.permute.xlu0 %1368 }
 0x366   :  { %1410 = vadd.xlane.f32.xlu0 %v1409_v40  ;;  %v1424_v44 = vsel %vm615_vm1, %v4022_v30, 0.0  ;;  %v4317_v40 = vpack.i.bf16 %v4315_v11, %v4316_v16  ;;  %v4334_v11 = vld [vmem:[#allocation30_spill] sm:$0xff] }
 0x367   :  { %1404 = vadd.xlane.f32.xlu1 %v1403_v61  ;;  %v4318_v61 = vld [vmem:[#allocation19_spill] sm:$0xff] }
 0x36a   :  { %1413 = vadd.xlane.f32.xlu0 %v1412_v46  ;;  %v4319_v46 = vld [vmem:[#allocation20_spill] sm:$0xff] }
 0x36b   :  { %1416 = vadd.xlane.f32.xlu1 %v1415_v54  ;;  %v4320_v54 = vpack.i.bf16 %v4318_v61, %v4319_v46  ;;  %v143_v61 = vld [vmem:[#allocation8 + $0x10] sm:$0xff]  ;;  %v144_v46 = vld [vmem:[#allocation8 + $0x18] sm:$0xff] }
 0x36e   :  { %1419 = vadd.xlane.f32.xlu0 %v1418_v12  ;;  %v4321_v12 = vld [vmem:[#allocation23_spill] sm:$0xff] }
 0x36f   :  { %1422 = vadd.xlane.f32.xlu1 %v1421_v37  ;;  %v4322_v37 = vld [vmem:[#allocation24_spill] sm:$0xff] }
 0x370   :  { %v4026_v52 = vpop.permute.xlu1 %1370 }
 0x371   :  { %v1427_v8 = vsel %vm615_vm1, %v4026_v52, 0.0 }
 0x372   :  { %1425 = vadd.xlane.f32.xlu0 %v1424_v44  ;;  %v4323_v44 = vpack.i.bf16 %v4321_v12, %v4322_v37  ;;  %v2917_v12 = vunpack.i.l.bf16 %v3951_v38 }
 0x373   :  { %1428 = vadd.xlane.f32.xlu1 %v1427_v8  ;;  %v4324_v8 = vld [vmem:[#allocation21_spill] sm:$0xff] }
 0x374   :  { %v4032_v62 = vpop.permute.xlu0 %1372 }
 0x375   :  { %v1430_v4 = vsel %vm615_vm1, %v4032_v62, 0.0 }
 0x376   :  { %1431 = vadd.xlane.f32.xlu0 %v1430_v4  ;;  %v4325_v4 = vld [vmem:[#allocation22_spill] sm:$0xff] }
 0x377   :  { %v4326_v58 = vpack.i.bf16 %v4324_v8, %v4325_v4 }
 0x378   :  { %v4036_v22 = vpop.permute.xlu1 %1374 }
 0x379   :  { %v1433_v59 = vsel %vm615_vm1, %v4036_v22, 0.0 }
 0x37a   :  { %1434 = vadd.xlane.f32.xlu1 %v1433_v59  ;;  %v4327_v59 = vld [vmem:[#allocation27_spill] sm:$0xff] }
 0x39a   :  { %v4040_v1 = vpop.permute.xlu0 %1376 }
 0x39b   :  { %v1436_v39 = vsel %vm615_vm1, %v4040_v1, 0.0 }
 0x39c   :  { %1437 = vadd.xlane.f32.xlu0 %v1436_v39  ;;  %v4328_v39 = vld [vmem:[#allocation28_spill] sm:$0xff] }
 0x3ad   :  { %v4044_v10 = vpop.permute.xlu1 %1378 }
 0x3ae   :  { %v1439_v25 = vsel %vm615_vm1, %v4044_v10, 0.0 }
 0x3af   :  { %1440 = vadd.xlane.f32.xlu1 %v1439_v25  ;;  %v4329_v25 = vpack.i.bf16 %v4327_v59, %v4328_v39  ;;  %v2923_v59 = vunpack.i.h.bf16 %v3964_v42  ;;  %v2922_v39 = vunpack.i.l.bf16 %v3964_v42  ;;  %v2933_v42 = vunpack.i.h.bf16 %v3983_v63 }
 0x3b1   :  { %v4048_v50 = vpop.permute.xlu0 %1380 }
 0x3b2   :  { %v1442_v31 = vsel %vm615_vm1, %v4048_v50, 0.0 }
 0x3b3   :  { %1443 = vadd.xlane.f32.xlu0 %v1442_v31  ;;  %v141_v31 = vld [vmem:[#allocation8] sm:$0xff] }
 0x3b5   :  { %v4052_v0 = vpop.permute.xlu1 %1382 }
 0x3b6   :  { %v1445_v47 = vsel %vm615_vm1, %v4052_v0, 0.0 }
 0x3b7   :  { %1446 = vadd.xlane.f32.xlu1 %v1445_v47  ;;  %v4330_v47 = vld [vmem:[#allocation25_spill] sm:$0xff] }
 0x3b8   :  { %v4332_v41 = vpack.i.bf16 %v4330_v47, %v4331_v36  ;;  %v2937_v36 = vunpack.i.l.bf16 %v3986_v49 }
 0x3c8   :  { %2955 = vrot.lane.b32.xlu1 %v4314_v48, %s3266_s4  ;;  %v4333_v48 = vld [vmem:[#allocation29_spill] sm:$0xff] }
 0x3c9   :  { %2950 = vrot.lane.b32.xlu0 %v4317_v40, %s3266_s4  ;;  %v4335_v16 = vpack.i.bf16 %v4333_v48, %v4334_v11  ;;  %v142_v40 = vld [vmem:[#allocation8 + $0x8] sm:$0xff]  ;;  %v2942_v48 = vunpack.i.l.bf16 %v3994_v53 }
 0x3cc   :  { %2960 = vrot.lane.b32.xlu1 %v4320_v54, %s3266_s4  ;;  %v2918_v54 = vunpack.i.h.bf16 %v3951_v38  ;;  %v2798_v38 = vpack.c.bf16 %v2923_v59, %v2922_v39 }
 0x3cd   :  { %2970 = vrot.lane.b32.xlu0 %v4323_v44, %s3266_s4 }
 0x3ce   :  { %v2792_v8 = vpack.c.bf16 %v2918_v54, %v2917_v12 }
 0x3d0   :  { %2965 = vrot.lane.b32.xlu1 %v4326_v58, %s3266_s4 }
 0x3d1   :  { %2980 = vrot.lane.b32.xlu0 %v4329_v25, %s3266_s4  ;;  %v2927_v25 = vunpack.i.l.bf16 %v3975_v9 }
 0x3d4   :  { %2975 = vrot.lane.b32.xlu1 %v4332_v41, %s3266_s4 }
 0x3d5   :  { %1136 = vperm.xlu0 %2989, %v141_v31  }
 0x3d8   :  { %2985 = vrot.lane.b32.xlu1 %v4335_v16, %s3266_s4 }
 0x3d9   :  { %1151 = vperm.xlu0 %2989, %v144_v46  }
 0x3dc   :  { %1141 = vperm.xlu1 %2990, %v142_v40   ;;  %v2947_v40 = vunpack.i.l.bf16 %v3988_v28 }
 0x3e0   :  { %1146 = vperm.xlu1 %2990, %v143_v61  }
 0x3e9   :  { %v2492_v37 = vpop.f32.mrb[48].mxu0 }
 0x3ea   :  { %v1115_v44 = vpop.f32.mrb[49].mxu0 }
 0x3eb   :  { %2528 = vmatprep.mubr.f32.mxu1 %v1115_v44  ;;  %v4123_v16 = vpop.xlane.xlu0 %1401 }
 0x3ec   :  { %2529 = vmatmul.mubr.f32.vlgmr.msra.gmra.mrb[16].mxu1 %v2492_v37 }
 0x3ed   :  { %2791 = vmatpush3.bf16.xpose.msk.msra.mxu1 %vm3615_vm3, %v3869_v20  ;;  %v2495_v4 = vpop.f32.mrb[50].mxu0  ;;  %v2928_v20 = vunpack.i.h.bf16 %v3975_v9  ;;  %v2938_v9 = vunpack.i.h.bf16 %v3986_v49  ;;  %v2948_v49 = vunpack.i.h.bf16 %v3988_v28 }
 0x3ee   :  { %2794 = vmatprep.subr.msk.bf16.mxu1 %vm3615_vm3, %v2792_v8  ;;  %v1125_v58 = vpop.f32.mrb[51].mxu0 }
 0x3ef   :  { %2531 = vmatprep.mubr.f32.mxu1 %v1125_v58  ;;  %v2804_v31 = vpack.c.bf16 %v2928_v20, %v2927_v25  ;;  %v2816_v41 = vpack.c.bf16 %v2938_v9, %v2937_v36  ;;  %v4131_v61 = vpop.xlane.xlu0 %1407  ;;  %v2828_v46 = vpack.c.bf16 %v2948_v49, %v2947_v40 }
 0x3f0   :  { %2532 = vmatmul.mubr.f32.gmra.mrb[18].mxu1 %v2495_v4 }
 0x3f1   :  { %2566 = vmatprep.mubr.msk.f32.mxu1 %vm615_vm1, %v3990_v55  ;;  %v2932_v55 = vunpack.i.l.bf16 %v3983_v63  ;;  %v2943_v63 = vunpack.i.h.bf16 %v3994_v53 }
 0x3f3   :  { %v2810_v47 = vpack.c.bf16 %v2933_v42, %v2932_v55  ;;  %v2822_v11 = vpack.c.bf16 %v2943_v63, %v2942_v48  ;;  %v4137_v53 = vpop.xlane.xlu0 %1410 }
 0x3f4   :  { %v4141_v54 = vpop.xlane.xlu1 %1404 }
 0x3f5   :  { %2797 = vmatpush3.bf16.xpose.msk.msra.mxu1 %vm3615_vm3, %v2792_v8  ;;  %3087 = vrcp.f32 %v4141_v54 }
 0x3f6   :  { %2800 = vmatprep.subr.msk.bf16.mxu1 %vm3615_vm3, %v2798_v38  ;;  %3089 = vrcp.f32 %v4123_v16 }
 0x3f7   :  { %v4143_v12 = vpop.xlane.xlu0 %1413  ;;  %3091 = vrcp.f32 %v4137_v53 }
 0x3f8   :  { %v4145_v37 = vpop.xlane.xlu1 %1416  ;;  %3093 = vrcp.f32 %v4131_v61 }
 0x3f9   :  { %3095 = vrcp.f32 %v4145_v37 }
 0x3fa   :  { %3097 = vrcp.f32 %v4143_v12 }
 0x3fb   :  { %v4147_v28 = vpop.xlane.xlu0 %1419 }
 0x3fc   :  { %v4157_v43 = vpop.xlane.xlu1 %1422 }
 0x3fd   :  { %2803 = vmatpush3.bf16.xpose.msk.msra.mxu1 %vm3615_vm3, %v2798_v38  ;;  %3099 = vrcp.f32 %v4157_v43 }
 0x3fe   :  { %2806 = vmatprep.subr.msk.bf16.mxu1 %vm3615_vm3, %v2804_v31  ;;  %3101 = vrcp.f32 %v4147_v28 }
 0x3ff   :  { %v4159_v44 = vpop.xlane.xlu0 %1425 }
 0x403   :  { %v4167_v8 = vpop.xlane.xlu0 %1431 }
 0x405   :  { %2809 = vmatpush3.bf16.xpose.msk.msra.mxu1 %vm3615_vm3, %v2804_v31 }
 0x406   :  { %2812 = vmatprep.subr.msk.bf16.mxu1 %vm3615_vm3, %v2810_v47 }
 0x40d   :  { %2815 = vmatpush3.bf16.xpose.msk.msra.mxu1 %vm3615_vm3, %v2810_v47 }
 0x40e   :  { %2818 = vmatprep.subr.msk.bf16.mxu1 %vm3615_vm3, %v2816_v41 }
 0x415   :  { %2821 = vmatpush3.bf16.xpose.msk.msra.mxu1 %vm3615_vm3, %v2816_v41 }
 0x416   :  { %2824 = vmatprep.subr.msk.bf16.mxu1 %vm3615_vm3, %v2822_v11 }
 0x41d   :  { %2827 = vmatpush3.bf16.xpose.msk.msra.mxu1 %vm3615_vm3, %v2822_v11 }
 0x41e   :  { %2830 = vmatprep.subr.msk.bf16.mxu1 %vm3615_vm3, %v2828_v46 }
 0x425   :  { %2833 = vmatpush3.bf16.xpose.msk.msra.mxu1 %vm3615_vm3, %v2828_v46 }
 0x42c   :  { %2567 = vmatmul.mubr.msk.f32.vlgmr.msra.gmra.mrb[20].mxu1 %vm615_vm1, %v3992_v24  ;;  %v4165_v24 = vpop.xlane.xlu1 %1428 }
 0x42d   :  { %2569 = vmatprep.mubr.msk.f32.mxu1 %vm615_vm1, %v3998_v7  ;;  %3103 = vrcp.f32 %v4165_v24 }
 0x42e   :  { %3105 = vrcp.f32 %v4159_v44 }
 0x430   :  { %2570 = vmatmul.mubr.msk.f32.gmra.mrb[22].mxu1 %vm615_vm1, %v4000_v33  ;;  %v4173_v7 = vpop.xlane.xlu1 %1434  ;;  %v4175_v33 = vpop.xlane.xlu0 %1437 }
 0x431   :  { %2572 = vmatprep.mubr.msk.f32.mxu1 %vm615_vm1, %v4004_v27  ;;  %3107 = vrcp.f32 %v4173_v7 }
 0x432   :  { %3109 = vrcp.f32 %v4167_v8 }
 0x434   :  { %2573 = vmatmul.mubr.msk.f32.gmra.mrb[24].mxu1 %vm615_vm1, %v4006_v34 }
 0x435   :  { %2575 = vmatprep.mubr.msk.f32.mxu1 %vm615_vm1, %v4014_v18 }
 0x438   :  { %2576 = vmatmul.mubr.msk.f32.gmra.mrb[26].mxu1 %vm615_vm1, %v4018_v45 }
 0x439   :  { %2578 = vmatprep.mubr.msk.f32.mxu1 %vm615_vm1, %v4022_v30 }
 0x43c   :  { %2579 = vmatmul.mubr.msk.f32.gmra.mrb[28].mxu1 %vm615_vm1, %v4026_v52  ;;  %v4181_v27 = vpop.xlane.xlu1 %1440 }
 0x43d   :  { %2581 = vmatprep.mubr.msk.f32.mxu1 %vm615_vm1, %v4032_v62  ;;  %3111 = vrcp.f32 %v4181_v27 }
 0x43e   :  { %3113 = vrcp.f32 %v4175_v33 }
 0x440   :  { %2582 = vmatmul.mubr.msk.f32.gmra.mrb[30].mxu1 %vm615_vm1, %v4036_v22  ;;  %v4185_v34 = vpop.xlane.xlu0 %1443 }
 0x441   :  { %2584 = vmatprep.mubr.msk.f32.mxu1 %vm615_vm1, %v4040_v1 }
 0x444   :  { %2585 = vmatmul.mubr.msk.f32.gmra.mrb[32].mxu1 %vm615_vm1, %v4044_v10  ;;  %v4191_v18 = vpop.xlane.xlu1 %1446  ;;  %v2951_v45 = vpop.permute.xlu0 %2950 }
 0x445   :  { %v2953_v30 = vunpack.i.h.bf16 %v2951_v45  ;;  %v2952_v52 = vunpack.i.l.bf16 %v2951_v45  ;;  %2587 = vmatprep.mubr.msk.f32.mxu1 %vm615_vm1, %v4048_v50  ;;  %3115 = vrcp.f32 %v4191_v18 }
 0x446   :  { %3117 = vrcp.f32 %v4185_v34 }
 0x447   :  { %v2866_v62 = vpack.c.bf16 %v2953_v30, %v2952_v52 }
 0x448   :  { %2588 = vmatmul.mubr.msk.f32.gmra.mrb[34].mxu1 %vm615_vm1, %v4052_v0  ;;  %v2956_v22 = vpop.permute.xlu1 %2955  ;;  %v2971_v38 = vpop.permute.xlu0 %2970 }
 0x449   :  { %v2958_v4 = vunpack.i.h.bf16 %v2956_v22  ;;  %v2957_v58 = vunpack.i.l.bf16 %v2956_v22  ;;  %2867 = vmatprep.subr.bf16.mxu1 %v2866_v62  ;;  %v2973_v31 = vunpack.i.h.bf16 %v2971_v38  ;;  %v2972_v50 = vunpack.i.l.bf16 %v2971_v38 }
 0x44a   :  { %2869 = vmatpush3.bf16.msra.mxu1 %v2866_v62 }
 0x44b   :  { %v2870_v1 = vpack.c.bf16 %v2958_v4, %v2957_v58  ;;  %v2882_v9 = vpack.c.bf16 %v2973_v31, %v2972_v50 }
 0x44c   :  { %v2961_v59 = vpop.permute.xlu1 %2960  ;;  %v2981_v63 = vpop.permute.xlu0 %2980 }
 0x44d   :  { %v2963_v10 = vunpack.i.h.bf16 %v2961_v59  ;;  %v2962_v39 = vunpack.i.l.bf16 %v2961_v59  ;;  %2871 = vmatprep.subr.bf16.mxu1 %v2870_v1  ;;  %v2983_v48 = vunpack.i.h.bf16 %v2981_v63  ;;  %v2982_v11 = vunpack.i.l.bf16 %v2981_v63 }
 0x44e   :  { %2873 = vmatpush3.bf16.msra.mxu1 %v2870_v1 }
 0x44f   :  { %v2874_v20 = vpack.c.bf16 %v2963_v10, %v2962_v39  ;;  %v2890_v46 = vpack.c.bf16 %v2983_v48, %v2982_v11  ;;  %v3088_v39 = vpop.eup %3087 }
 0x450   :  { %v2966_v25 = vpop.permute.xlu1 %2965 }
 0x451   :  { %v2968_v42 = vunpack.i.h.bf16 %v2966_v25  ;;  %v2967_v55 = vunpack.i.l.bf16 %v2966_v25  ;;  %2875 = vmatprep.subr.bf16.mxu1 %v2874_v20 }
 0x452   :  { %2877 = vmatpush3.bf16.msra.mxu1 %v2874_v20  ;;  %v3090_v20 = vpop.eup %3089 }
 0x453   :  { %v2878_v0 = vpack.c.bf16 %v2968_v42, %v2967_v55  ;;  %v3092_v37 = vpop.eup %3091 }
 0x454   :  { %v2976_v47 = vpop.permute.xlu1 %2975 }
 0x455   :  { %v2978_v36 = vunpack.i.h.bf16 %v2976_v47  ;;  %v2977_v41 = vunpack.i.l.bf16 %v2976_v47  ;;  %2879 = vmatprep.subr.bf16.mxu1 %v2878_v0 }
 0x456   :  { %2881 = vmatpush3.bf16.msra.mxu1 %v2878_v0 }
 0x457   :  { %2883 = vmatprep.subr.bf16.mxu1 %v2882_v9  ;;  %v2886_v49 = vpack.c.bf16 %v2978_v36, %v2977_v41 }
 0x458   :  { %v2986_v40 = vpop.permute.xlu1 %2985 }
 0x459   :  { %v2988_v45 = vunpack.i.h.bf16 %v2986_v40  ;;  %v2987_v30 = vunpack.i.l.bf16 %v2986_v40 }
 0x45a   :  { %2885 = vmatpush3.bf16.msra.mxu1 %v2882_v9 }
 0x45b   :  { %2887 = vmatprep.subr.bf16.mxu1 %v2886_v49  ;;  %v2894_v52 = vpack.c.bf16 %v2988_v45, %v2987_v30 }
 0x45e   :  { %2889 = vmatpush3.bf16.msra.mxu1 %v2886_v49 }
 0x45f   :  { %2891 = vmatprep.subr.bf16.mxu1 %v2890_v46 }
 0x462   :  { %2893 = vmatpush3.bf16.msra.mxu1 %v2890_v46 }
 0x463   :  { %2895 = vmatprep.subr.bf16.mxu1 %v2894_v52 }
 0x466   :  { %2897 = vmatpush3.bf16.msra.mxu1 %v2894_v52 }
 0x4bf   :  { %v4197_v62 = vpop.f32.mrb[16].mxu1 }
 0x4c0   :  { %v4199_v22 = vpop.f32.mrb[17].mxu1 }
 0x4c3   :  { %v4201_v4 = vpop.f32.mrb[18].mxu1 }
 0x4c4   :  { %v4203_v58 = vpop.f32.mrb[19].mxu1 }
 0x4ff   :  { %v2568_v1 = vpop.f32.mrb[20].mxu1 }
 0x500   :  { %v1706_v59 = vmul.f32 %v2568_v1, %v3892_v32  ;;  %v1626_v10 = vpop.f32.mrb[21].mxu1  ;;  %v3094_v32 = vpop.eup %3093 }
 0x501   :  { %v1705_v38 = vmul.f32 %v1626_v10, %v3894_v60  ;;  %v3096_v28 = vpop.eup %3095 }
 0x502   :  { %v1722_v25 = vmul.f32 %v3088_v39, %v1706_v59  ;;  %v3098_v47 = vpop.eup %3097 }
 0x503   :  { %v1721_v16 = vmul.f32 %v3090_v20, %v1705_v38  ;;  %v2571_v54 = vpop.f32.mrb[22].mxu1  ;;  %v3100_v41 = vpop.eup %3099 }
 0x504   :  { %v1708_v61 = vmul.f32 %v2571_v54, %v3900_v6  ;;  %v1636_v53 = vpop.f32.mrb[23].mxu1  ;;  %v3102_v48 = vpop.eup %3101 }
 0x505   :  { %v1707_v12 = vmul.f32 %v1636_v53, %v3902_v2  ;;  %v2834_v31 = vpack.c.bf16 %v1722_v25, %v1721_v16  ;;  %v3104_v8 = vpop.eup %3103 }
 0x506   :  { %v1724_v50 = vmul.f32 %v3092_v37, %v1708_v61  ;;  %v3106_v45 = vpop.eup %3105 }
 0x507   :  { %v1723_v60 = vmul.f32 %v3094_v32, %v1707_v12  ;;  %v2574_v42 = vpop.f32.mrb[24].mxu1  ;;  %2835 = vmatprep.subr.bf16.mxu0 %v2834_v31  ;;  %v3108_v1 = vpop.eup %3107 }
 0x508   :  { %v1710_v43 = vmul.f32 %v2574_v42, %v3908_v23  ;;  %v1646_v55 = vpop.f32.mrb[25].mxu1  ;;  %2837 = vmatpush3.bf16.xpose.msra.mxu0 %v2834_v31  ;;  %v3110_v10 = vpop.eup %3109 }
 0x509   :  { %v1709_v6 = vmul.f32 %v1646_v55, %v3910_v14  ;;  %v2838_v0 = vpack.c.bf16 %v1724_v50, %v1723_v60  ;;  %v3112_v18 = vpop.eup %3111  ;;  %v1137_v55 = vpop.permute.xlu0 %1136 }
 0x50a   :  { %v1726_v2 = vmul.f32 %v3096_v28, %v1710_v43  ;;  %v3114_v54 = vpop.eup %3113  ;;  %v1142_v28 = vpop.permute.xlu1 %1141 }
 0x50b   :  { %v1725_v9 = vmul.f32 %v3098_v47, %v1709_v6  ;;  %v2577_v36 = vpop.f32.mrb[26].mxu1  ;;  %2839 = vmatprep.subr.bf16.mxu0 %v2838_v0  ;;  %v3116_v12 = vpop.eup %3115 }
 0x50c   :  { %v1712_v24 = vmul.f32 %v2577_v36, %v3916_v26  ;;  %v1656_v44 = vpop.f32.mrb[27].mxu1  ;;  %v3118_v50 = vpop.eup %3117 }
 0x50d   :  { %v1711_v23 = vmul.f32 %v1656_v44, %v3918_v29  ;;  %v2842_v63 = vpack.c.bf16 %v1726_v2, %v1725_v9  ;;  %v1226_v44 = vadd.f32 %v4197_v62, %v1142_v28 }
 0x50e   :  { %v1728_v11 = vmul.f32 %v3100_v41, %v1712_v24  ;;  %v1221_v41 = vadd.f32 %v4199_v22, %v1137_v55 }
 0x50f   :  { %v1727_v14 = vmul.f32 %v3102_v48, %v1711_v23  ;;  %v2580_v49 = vpop.f32.mrb[28].mxu1 }
 0x510   :  { %v1714_v7 = vmul.f32 %v2580_v49, %v3924_v35  ;;  %v1666_v40 = vpop.f32.mrb[29].mxu1  ;;  %2841 = vmatpush3.bf16.xpose.msra.mxu0 %v2838_v0 }
 0x511   :  { %v1713_v26 = vmul.f32 %v1666_v40, %v3926_v51  ;;  %2843 = vmatprep.subr.bf16.mxu0 %v2842_v63  ;;  %v2846_v46 = vpack.c.bf16 %v1728_v11, %v1727_v14 }
 0x512   :  { %v1730_v29 = vmul.f32 %v3104_v8, %v1714_v7 }
 0x513   :  { %v1729_v30 = vmul.f32 %v3106_v45, %v1713_v26  ;;  %v2583_v52 = vpop.f32.mrb[30].mxu1 }
 0x514   :  { %v1716_v27 = vmul.f32 %v2583_v52, %v3932_v13  ;;  %v1676_v33 = vpop.f32.mrb[31].mxu1 }
 0x515   :  { %v1715_v35 = vmul.f32 %v1676_v33, %v3934_v19  ;;  %v2850_v59 = vpack.c.bf16 %v1730_v29, %v1729_v30 }
 0x516   :  { %v1732_v39 = vmul.f32 %v3108_v1, %v1716_v27 }
 0x517   :  { %v1731_v51 = vmul.f32 %v3110_v10, %v1715_v35  ;;  %v2586_v38 = vpop.f32.mrb[32].mxu1 }
 0x518   :  { %v1718_v20 = vmul.f32 %v2586_v38, %v3941_v3  ;;  %v1686_v25 = vpop.f32.mrb[33].mxu1  ;;  %2845 = vmatpush3.bf16.xpose.msra.mxu0 %v2842_v63 }
 0x519   :  { %v1717_v16 = vmul.f32 %v1686_v25, %v3943_v15  ;;  %2847 = vmatprep.subr.bf16.mxu0 %v2846_v46  ;;  %v2854_v34 = vpack.c.bf16 %v1732_v39, %v1731_v51 }
 0x51a   :  { %v1734_v13 = vmul.f32 %v3112_v18, %v1718_v20 }
 0x51b   :  { %v1733_v61 = vmul.f32 %v3114_v54, %v1717_v16  ;;  %v2589_v53 = vpop.f32.mrb[34].mxu1 }
 0x51c   :  { %v1720_v19 = vmul.f32 %v2589_v53, %v3947_v56  ;;  %v1696_v37 = vpop.f32.mrb[35].mxu1 }
 0x51d   :  { %v1719_v31 = vmul.f32 %v1696_v37, %v3949_v5  ;;  %v2858_v32 = vpack.c.bf16 %v1734_v13, %v1733_v61 }
 0x51e   :  { %v1736_v3 = vmul.f32 %v3116_v12, %v1720_v19 }
 0x51f   :  { %v1735_v60 = vmul.f32 %v3118_v50, %v1719_v31 }
 0x520   :  { %2849 = vmatpush3.bf16.xpose.msra.mxu0 %v2846_v46 }
 0x521   :  { %2851 = vmatprep.subr.bf16.mxu0 %v2850_v59  ;;  %v2862_v42 = vpack.c.bf16 %v1736_v3, %v1735_v60 }
 0x528   :  { %2853 = vmatpush3.bf16.xpose.msra.mxu0 %v2850_v59 }
 0x529   :  { %2855 = vmatprep.subr.bf16.mxu0 %v2854_v34 }
 0x530   :  { %2857 = vmatpush3.bf16.xpose.msra.mxu0 %v2854_v34 }
 0x531   :  { %2859 = vmatprep.subr.bf16.mxu0 %v2858_v32 }
 0x538   :  { %2861 = vmatpush3.bf16.xpose.msra.mxu0 %v2858_v32 }
 0x539   :  { %2863 = vmatprep.subr.bf16.mxu0 %v2862_v42 }
 0x540   :  { %2865 = vmatpush3.bf16.xpose.msra.mxu0 %v2862_v42 }
 0x547   :  { %2623 = vmatmul.mubr.f32.vlgmr.msra.gmra.mrb[52].mxu0 %v3962_v17  ;;  %v1152_v17 = vpop.permute.xlu0 %1151 }
 0x548   :  { %2625 = vmatprep.mubr.f32.mxu0 %v3966_v57  ;;  %v1236_v14 = vadd.f32 %v4201_v4, %v1152_v17 }
 0x54b   :  { %2626 = vmatmul.mubr.f32.gmra.mrb[54].mxu0 %v3970_v21  ;;  %v1147_v21 = vpop.permute.xlu1 %1146 }
 0x54c   :  { %v1231_v49 = vadd.f32 %v4203_v58, %v1147_v21 }
 0x61a   :  { %v2624_v15 = vpop.f32.mrb[52].mxu0 }
 0x61b   :  { %v1803_v56 = vpop.f32.mrb[53].mxu0 }
 0x61c   :  { %2660 = vmatprep.mubr.f32.mxu1 %v1803_v56 }
 0x61d   :  { %2661 = vmatmul.mubr.f32.vlgmr.msra.gmra.mrb[36].mxu1 %v2624_v15 }
 0x61e   :  { %v2627_v5 = vpop.f32.mrb[54].mxu0 }
 0x61f   :  { %v1813_v43 = vpop.f32.mrb[55].mxu0 }
 0x620   :  { %2663 = vmatprep.mubr.f32.mxu1 %v1813_v43 }
 0x621   :  { %2664 = vmatmul.mubr.f32.gmra.mrb[38].mxu1 %v2627_v5 }
 0x6f0   :  { %v2662_v6 = vpop.f32.mrb[36].mxu1 }
 0x6f1   :  { %v1958_v0 = vadd.f32 %v2662_v6, %v1142_v28  ;;  %v1952_v47 = vpop.f32.mrb[37].mxu1 }
 0x6f2   :  { %v1953_v2 = vadd.f32 %v1952_v47, %v1137_v55 }
 0x6f3   :  { %1977 = vrot.lane.b32.xlu0 %v1958_v0, %s3268_s28 }
 0x6f4   :  { %1975 = vrot.lane.b32.xlu1 %v1953_v2, %s3268_s28  ;;  %v2665_v57 = vpop.f32.mrb[38].mxu1 }
 0x6f5   :  { %v1968_v9 = vadd.f32 %v2665_v57, %v1152_v17  ;;  %v1962_v36 = vpop.f32.mrb[39].mxu1 }
 0x6f6   :  { %v1963_v24 = vadd.f32 %v1962_v36, %v1147_v21 }
 0x6f7   :  { %1981 = vrot.lane.b32.xlu0 %v1968_v9, %s3268_s28 }
 0x6f8   :  { %1979 = vrot.lane.b32.xlu1 %v1963_v24, %s3268_s28 }
 0x765   :  { %v1978_v23 = vpop.permute.xlu0 %1977 }
 0x766   :  { %v1988_v63 = vsel %vm615_vm1, %v1226_v44, %v1978_v23  ;;  %v1976_v48 = vpop.permute.xlu1 %1975 }
 0x767   :  { %1992 = vst.msk [vmem:[#allocation11 + $0x8] sm:$0xff] %vm165_vm0, %v1988_v63  ;;  %v1987_v11 = vsel %vm615_vm1, %v1221_v41, %v1976_v48 }
 0x768   :  { %1991 = vst.msk [vmem:[#allocation11] sm:$0xff] %vm165_vm0, %v1987_v11 }
 0x769   :  { %v1982_v7 = vpop.permute.xlu0 %1981 }
 0x76a   :  { %v1990_v62 = vsel %vm615_vm1, %v1236_v14, %v1982_v7  ;;  %v1980_v22 = vpop.permute.xlu1 %1979 }
 0x76b   :  { %1994 = vst.msk [vmem:[#allocation11 + $0x18] sm:$0xff] %vm165_vm0, %v1990_v62  ;;  %v1989_v40 = vsel %vm615_vm1, %v1231_v49, %v1980_v22 }
 0x76c   :  { %1993 = vst.msk [vmem:[#allocation11 + $0x10] sm:$0xff] %vm165_vm0, %v1989_v40 }
 0x76d   :  { %3240 = shalt.err (!%p3237_p2)
}
 0x76e   :  { %s3241_s9 = scalar_lea.hbm %s4272_s5, 512 }
 0x76f   :  { %p3242_p3 = scmp.ne.s32.totalorder %s4272_s5, %s3241_s9  ;;  %p3245_p4 = scmp.lt.u32.totalorder %s3241_s9, %s4272_s5 }
 0x771   :  { %p3247_p5 = pnand %p3245_p4, %p3242_p3 }
 0x773   :  { %3250 = shalt.err (!%p3247_p5)
}
 0x774   :  { %2006 = dma.vmem_to_hbm [thread:$0]  %s2001_s3, 512, %s4272_s5, [#allocation4], %s3261_s30, %s3261_s30, %s3262_s6  }
 0x775   :  { %3257 = dma.done.wait [#allocation4], 512  }
 0x776   :  { %3258 = vsyncadd [#allocation4], 4294966784 }
 0x777   :  { %2010 = vsyncpa [#allocation3], 1 }
 0x778   :  { %2011 = vsyncpa [#allocation6], 1 }
 0x779   :  { %2012 = vsyncpa [#allocation9], 1 }
 0x77a   :  { %2013 = vsyncpa [#allocation4], 1 }

</bundles_post_ra>
